<compile_context>
chip_gen: v6e
topology: v6e:2x2x1
jax: 0.10.0
libtpu: 0.0.40
codegen_flags: <defaults>
</compile_context>

<pallas_src>
import numpy as np

import jax
import jax.numpy as jnp
from jax import lax
from jax.experimental import pallas as pl
from jax.experimental.pallas import tpu as pltpu


# ----------------------------------------------------------------------------
# Fused kernel: conv1 -> pool/relu -> conv2 -> pool/relu -> fc1/relu -> fc2
# (one grid step == one image)
# ----------------------------------------------------------------------------
def _cnn_fused_kernel(x_ref, a1_ref, b1_ref, s1e_ref, s1o_ref, p1e_ref, p1o_ref,
                      b2m_ref, b2b_ref, s2e_ref, s2o_ref, p2e_ref, p2o_ref,
                      wf1_ref, bf1_ref, wf2_ref, bf2_ref,
                      out_ref, h1_s, h2_s):
    f32 = jnp.float32

    # ---- conv1: 5 accumulated matmuls contracting the input width (banded W).
    # x slab (24, 28) @ A1[kh] (28, 240)  ->  (24, 240), lane = ow*10 + co
    h = jnp.dot(x_ref[0, 0:24, :], a1_ref[0], preferred_element_type=f32)
    for kh in range(1, 5):
        h = h + jnp.dot(x_ref[0, kh:kh + 24, :], a1_ref[kh],
                        preferred_element_type=f32)
    h = h + b1_ref[...]                                              # (24, 240)

    # ---- maxpool 2x2 + relu (row pairs via left 0/1 matmuls, col pairs via
    #      right 0/1 matmuls), output (12, 120), lane = ow2*10 + ci
    h = jnp.maximum(jnp.dot(s1e_ref[...], h, preferred_element_type=f32),
                    jnp.dot(s1o_ref[...], h, preferred_element_type=f32))
    h = jnp.maximum(jnp.dot(h, p1e_ref[...], preferred_element_type=f32),
                    jnp.dot(h, p1o_ref[...], preferred_element_type=f32))
    h1_s[...] = jnp.maximum(h, 0.0)

    # ---- conv2: same banded-width formulation, input channels folded into the
    #      contraction.  slab (8, 120) @ B2[kh] (120, 160) -> (8, 160)
    g = jnp.dot(h1_s[0:8, :], b2m_ref[0], preferred_element_type=f32)
    for kh in range(1, 5):
        g = g + jnp.dot(h1_s[kh:kh + 8, :], b2m_ref[kh],
                        preferred_element_type=f32)
    g = g + b2b_ref[...]                                             # (8, 160)

    # ---- maxpool 2x2 + relu -> (4, 80), lane = ow2*20 + co
    g = jnp.maximum(jnp.dot(s2e_ref[...], g, preferred_element_type=f32),
                    jnp.dot(s2o_ref[...], g, preferred_element_type=f32))
    g = jnp.maximum(jnp.dot(g, p2e_ref[...], preferred_element_type=f32),
                    jnp.dot(g, p2o_ref[...], preferred_element_type=f32))
    h2_s[...] = jnp.maximum(g, 0.0)

    # ---- fc1: contraction over the 4 pooled rows x 80 lanes = 320 features
    #      (weights pre-permuted to this layout), then relu.
    f = bf1_ref[...]                                                 # (1, 50)
    for s in range(4):
        f = f + jnp.dot(h2_s[s:s + 1, :], wf1_ref[s],
                        preferred_element_type=f32)
    f = jnp.maximum(f, 0.0)

    # ---- fc2
    out_ref[0] = jnp.dot(f, wf2_ref[...], preferred_element_type=f32) + bf2_ref[...]


# ----------------------------------------------------------------------------
# One-time host-side weight repacking (pure numpy; done once per parameter set)
# ----------------------------------------------------------------------------
def prepare_params(params):
    w1, b1, w2, b2, wf1, bf1, wf2, bf2 = [np.asarray(p, np.float32) for p in params]
    K = 5
    OW1, C1 = 24, 10        # conv1 output width / channels
    OW2, C2, Cin2 = 8, 20, 10  # conv2 output width / channels / input channels

    # conv1 banded matrices: A1[kh, iw, ow*10+co] = w1[co, 0, kh, iw-ow]
    A1 = np.zeros((K, 28, OW1 * C1), np.float32)
    for kh in range(K):
        for ow in range(OW1):
            for kw in range(K):
                A1[kh, ow + kw, ow * C1:(ow + 1) * C1] = w1[:, 0, kh, kw]
    b1t = np.tile(b1, OW1).reshape(1, OW1 * C1)

    # pool1 selection matrices (rows 24->12, lane groups 24->12)
    S1e = np.zeros((12, 24), np.float32)
    S1o = np.zeros((12, 24), np.float32)
    for i in range(12):
        S1e[i, 2 * i] = 1.0
        S1o[i, 2 * i + 1] = 1.0
    P1e = np.zeros((OW1 * C1, 12 * C1), np.float32)
    P1o = np.zeros_like(P1e)
    for j in range(12):
        for c in range(C1):
            P1e[(2 * j) * C1 + c, j * C1 + c] = 1.0
            P1o[(2 * j + 1) * C1 + c, j * C1 + c] = 1.0

    # conv2 banded matrices: B2[kh, iw*10+ci, ow*20+co] = w2[co, ci, kh, iw-ow]
    B2 = np.zeros((K, 12 * Cin2, OW2 * C2), np.float32)
    for kh in range(K):
        for ow in range(OW2):
            for kw in range(K):
                B2[kh, (ow + kw) * Cin2:(ow + kw + 1) * Cin2,
                   ow * C2:(ow + 1) * C2] = w2[:, :, kh, kw].T
    b2t = np.tile(b2, OW2).reshape(1, OW2 * C2)

    # pool2 selection matrices (rows 8->4, lane groups 8->4)
    S2e = np.zeros((4, 8), np.float32)
    S2o = np.zeros((4, 8), np.float32)
    for i in range(4):
        S2e[i, 2 * i] = 1.0
        S2o[i, 2 * i + 1] = 1.0
    P2e = np.zeros((OW2 * C2, 4 * C2), np.float32)
    P2o = np.zeros_like(P2e)
    for j in range(4):
        for c in range(C2):
            P2e[(2 * j) * C2 + c, j * C2 + c] = 1.0
            P2o[(2 * j + 1) * C2 + c, j * C2 + c] = 1.0

    # fc1 weights permuted to the kernel layout (row s=oh2, lane l=ow2*20+co);
    # PyTorch .view(-1, 320) ordering is co*16 + oh2*4 + ow2.
    wf1r = np.zeros((4, 80, 50), np.float32)
    for s in range(4):
        for l in range(80):
            co, ow2 = l % C2, l // C2
            wf1r[s, l, :] = wf1[:, co * 16 + s * 4 + ow2]
    bf1r = bf1.reshape(1, 50)
    wf2t = wf2.T.copy()            # (50, 10)
    bf2r = bf2.reshape(1, 10)

    arrs = (A1, b1t, S1e, S1o, P1e, P1o, B2, b2t, S2e, S2o, P2e, P2o,
            wf1r, bf1r, wf2t, bf2r)
    return tuple(jnp.asarray(a) for a in arrs)


# ----------------------------------------------------------------------------
# Forward pass: a single pallas_call over the batch
# ----------------------------------------------------------------------------
def cnn_forward(x, prepped):
    weights = tuple(prepped)
    N = x.shape[0]
    x3 = x.reshape(N, 28, 28).astype(jnp.float32)

    def resident(a):
        zeros = (0,) * a.ndim
        return pl.BlockSpec(a.shape, lambda b, _z=zeros: _z)

    out = pl.pallas_call(
        _cnn_fused_kernel,
        out_shape=jax.ShapeDtypeStruct((N, 1, 10), jnp.float32),
        grid=(N,),
        in_specs=[pl.BlockSpec((1, 28, 28), lambda b: (b, 0, 0))]
                 + [resident(a) for a in weights],
        out_specs=pl.BlockSpec((1, 1, 10), lambda b: (b, 0, 0)),
        scratch_shapes=[pltpu.VMEM((12, 120), jnp.float32),
                        pltpu.VMEM((4, 80), jnp.float32)],
        compiler_params=pltpu.CompilerParams(
            dimension_semantics=("parallel",)),
    )(x3, *weights)
    return out.reshape(N, 10)


cnn_forward_jit = jax.jit(cnn_forward)


# ----------------------------------------------------------------------------
# Pure-JAX reference for correctness checking.
# ----------------------------------------------------------------------------
def cnn_forward_ref(x, params):
    w1, b1, w2, b2, wf1, bf1, wf2, bf2 = params

    def conv(x, w, b):
        y = lax.conv_general_dilated(
            x, w, window_strides=(1, 1), padding="VALID",
            dimension_numbers=("NCHW", "OIHW", "NCHW"))
        return y + b[None, :, None, None]

    def pool_relu(y):
        m = lax.reduce_window(y, -jnp.inf, lax.max,
                              (1, 1, 2, 2), (1, 1, 2, 2), "VALID")
        return jnp.maximum(m, 0.0)

    h = pool_relu(conv(x, w1, b1))
    h = pool_relu(conv(h, w2, b2))
    h = h.reshape(-1, 320)
    h = jnp.maximum(h @ wf1.T + bf1, 0.0)
    return h @ wf2.T + bf2


def init_params(key):
    def uniform(k, shape, fan_in):
        bound = 1.0 / jnp.sqrt(fan_in)
        return jax.random.uniform(k, shape, jnp.float32, -bound, bound)

    ks = jax.random.split(key, 8)
    w1 = uniform(ks[0], (10, 1, 5, 5), 1 * 5 * 5)
    b1 = uniform(ks[1], (10,), 1 * 5 * 5)
    w2 = uniform(ks[2], (20, 10, 5, 5), 10 * 5 * 5)
    b2 = uniform(ks[3], (20,), 10 * 5 * 5)
    wf1 = uniform(ks[4], (50, 320), 320)
    bf1 = uniform(ks[5], (50,), 320)
    wf2 = uniform(ks[6], (10, 50), 50)
    bf2 = uniform(ks[7], (10,), 50)
    return (w1, b1, w2, b2, wf1, bf1, wf2, bf2)


if __name__ == "__main__":
    key = jax.random.PRNGKey(0)
    k_params, k_x = jax.random.split(key)
    params = init_params(k_params)
    # batch=2, 1 input channel, 28x28 spatial (required for the 320-dim flatten)
    x = jax.random.normal(k_x, (2, 1, 28, 28), dtype=jnp.float32)

    prepped = prepare_params(params)
    out = jax.block_until_ready(cnn_forward_jit(x, prepped))
    ref = jax.block_until_ready(cnn_forward_ref(x, params))

    assert out.shape == (2, 10), out.shape
    max_err = float(jnp.max(jnp.abs(out - ref)))
    assert jnp.allclose(out, ref, rtol=1e-3, atol=1e-3), max_err
    print("KERNEL_OK")
</pallas_src>

<mosaic_0001>
module attributes {stable_mosaic.version = 11 : i64} {
  func.func @_cnn_fused_kernel(%arg0: i32, %arg1: memref<1x28x28xf32, #tpu.memory_space<vmem>>, %arg2: memref<5x28x240xf32, #tpu.memory_space<vmem>>, %arg3: memref<1x240xf32, #tpu.memory_space<vmem>>, %arg4: memref<12x24xf32, #tpu.memory_space<vmem>>, %arg5: memref<12x24xf32, #tpu.memory_space<vmem>>, %arg6: memref<240x120xf32, #tpu.memory_space<vmem>>, %arg7: memref<240x120xf32, #tpu.memory_space<vmem>>, %arg8: memref<5x120x160xf32, #tpu.memory_space<vmem>>, %arg9: memref<1x160xf32, #tpu.memory_space<vmem>>, %arg10: memref<4x8xf32, #tpu.memory_space<vmem>>, %arg11: memref<4x8xf32, #tpu.memory_space<vmem>>, %arg12: memref<160x80xf32, #tpu.memory_space<vmem>>, %arg13: memref<160x80xf32, #tpu.memory_space<vmem>>, %arg14: memref<4x80x50xf32, #tpu.memory_space<vmem>>, %arg15: memref<1x50xf32, #tpu.memory_space<vmem>>, %arg16: memref<50x10xf32, #tpu.memory_space<vmem>>, %arg17: memref<1x10xf32, #tpu.memory_space<vmem>>, %arg18: memref<1x1x10xf32, #tpu.memory_space<vmem>>, %arg19: memref<12x120xf32, #tpu.memory_space<vmem>>, %arg20: memref<4x80xf32, #tpu.memory_space<vmem>>) attributes {dimension_semantics = [#tpu.dimension_semantics<parallel>], iteration_bounds = array<i64: 2>, scalar_prefetch = 0 : i64, scratch_operands = 2 : i64, tpu.core_type = #tpu.core_type<tc>, window_params = [{transform_indices = @transform_0, window_bounds = array<i64: 1, 28, 28>}, {pipeline_mode = #tpu.pipeline_mode<synchronous>, transform_indices = @transform_1, window_bounds = array<i64: 5, 28, 240>}, {pipeline_mode = #tpu.pipeline_mode<synchronous>, transform_indices = @transform_2, window_bounds = array<i64: 1, 240>}, {pipeline_mode = #tpu.pipeline_mode<synchronous>, transform_indices = @transform_3, window_bounds = array<i64: 12, 24>}, {pipeline_mode = #tpu.pipeline_mode<synchronous>, transform_indices = @transform_4, window_bounds = array<i64: 12, 24>}, {pipeline_mode = #tpu.pipeline_mode<synchronous>, transform_indices = @transform_5, window_bounds = array<i64: 240, 120>}, {pipeline_mode = #tpu.pipeline_mode<synchronous>, transform_indices = @transform_6, window_bounds = array<i64: 240, 120>}, {pipeline_mode = #tpu.pipeline_mode<synchronous>, transform_indices = @transform_7, window_bounds = array<i64: 5, 120, 160>}, {pipeline_mode = #tpu.pipeline_mode<synchronous>, transform_indices = @transform_8, window_bounds = array<i64: 1, 160>}, {pipeline_mode = #tpu.pipeline_mode<synchronous>, transform_indices = @transform_9, window_bounds = array<i64: 4, 8>}, {pipeline_mode = #tpu.pipeline_mode<synchronous>, transform_indices = @transform_10, window_bounds = array<i64: 4, 8>}, {pipeline_mode = #tpu.pipeline_mode<synchronous>, transform_indices = @transform_11, window_bounds = array<i64: 160, 80>}, {pipeline_mode = #tpu.pipeline_mode<synchronous>, transform_indices = @transform_12, window_bounds = array<i64: 160, 80>}, {pipeline_mode = #tpu.pipeline_mode<synchronous>, transform_indices = @transform_13, window_bounds = array<i64: 4, 80, 50>}, {pipeline_mode = #tpu.pipeline_mode<synchronous>, transform_indices = @transform_14, window_bounds = array<i64: 1, 50>}, {pipeline_mode = #tpu.pipeline_mode<synchronous>, transform_indices = @transform_15, window_bounds = array<i64: 50, 10>}, {pipeline_mode = #tpu.pipeline_mode<synchronous>, transform_indices = @transform_16, window_bounds = array<i64: 1, 10>}, {transform_indices = @transform_17, window_bounds = array<i64: 1, 1, 10>}]} {
    %c0 = arith.constant 0 : index
    %c0_0 = arith.constant 0 : index
    %c0_1 = arith.constant 0 : index
    %0 = vector.load %arg1[%c0, %c0_0, %c0_1] : memref<1x28x28xf32, #tpu.memory_space<vmem>>, vector<1x24x28xf32>
    %1 = vector.shape_cast %0 : vector<1x24x28xf32> to vector<24x28xf32>
    %c0_2 = arith.constant 0 : index
    %c0_3 = arith.constant 0 : index
    %c0_4 = arith.constant 0 : index
    %2 = vector.load %arg2[%c0_2, %c0_3, %c0_4] : memref<5x28x240xf32, #tpu.memory_space<vmem>>, vector<1x28x240xf32>
    %3 = vector.shape_cast %2 : vector<1x28x240xf32> to vector<28x240xf32>
    %cst = arith.constant dense<0.000000e+00> : vector<24x240xf32>
    %4 = tpu.matmul %1, %3, %cst {dimension_numbers = #tpu.dot_dimension_numbers<[1], [0], [0], [1], [0, 0, 1, 1], [], []>} : vector<24x28xf32>, vector<28x240xf32>, vector<24x240xf32> -> vector<24x240xf32>
    %c0_5 = arith.constant 0 : index
    %c1 = arith.constant 1 : index
    %c0_6 = arith.constant 0 : index
    %5 = vector.load %arg1[%c0_5, %c1, %c0_6] : memref<1x28x28xf32, #tpu.memory_space<vmem>>, vector<1x24x28xf32>
    %6 = vector.shape_cast %5 : vector<1x24x28xf32> to vector<24x28xf32>
    %c1_7 = arith.constant 1 : index
    %c0_8 = arith.constant 0 : index
    %c0_9 = arith.constant 0 : index
    %7 = vector.load %arg2[%c1_7, %c0_8, %c0_9] : memref<5x28x240xf32, #tpu.memory_space<vmem>>, vector<1x28x240xf32>
    %8 = vector.shape_cast %7 : vector<1x28x240xf32> to vector<28x240xf32>
    %cst_10 = arith.constant dense<0.000000e+00> : vector<24x240xf32>
    %9 = tpu.matmul %6, %8, %cst_10 {dimension_numbers = #tpu.dot_dimension_numbers<[1], [0], [0], [1], [0, 0, 1, 1], [], []>} : vector<24x28xf32>, vector<28x240xf32>, vector<24x240xf32> -> vector<24x240xf32>
    %10 = arith.addf %4, %9 : vector<24x240xf32>
    %c0_11 = arith.constant 0 : index
    %c2 = arith.constant 2 : index
    %c0_12 = arith.constant 0 : index
    %11 = vector.load %arg1[%c0_11, %c2, %c0_12] : memref<1x28x28xf32, #tpu.memory_space<vmem>>, vector<1x24x28xf32>
    %12 = vector.shape_cast %11 : vector<1x24x28xf32> to vector<24x28xf32>
    %c2_13 = arith.constant 2 : index
    %c0_14 = arith.constant 0 : index
    %c0_15 = arith.constant 0 : index
    %13 = vector.load %arg2[%c2_13, %c0_14, %c0_15] : memref<5x28x240xf32, #tpu.memory_space<vmem>>, vector<1x28x240xf32>
    %14 = vector.shape_cast %13 : vector<1x28x240xf32> to vector<28x240xf32>
    %cst_16 = arith.constant dense<0.000000e+00> : vector<24x240xf32>
    %15 = tpu.matmul %12, %14, %cst_16 {dimension_numbers = #tpu.dot_dimension_numbers<[1], [0], [0], [1], [0, 0, 1, 1], [], []>} : vector<24x28xf32>, vector<28x240xf32>, vector<24x240xf32> -> vector<24x240xf32>
    %16 = arith.addf %10, %15 : vector<24x240xf32>
    %c0_17 = arith.constant 0 : index
    %c3 = arith.constant 3 : index
    %c0_18 = arith.constant 0 : index
    %17 = vector.load %arg1[%c0_17, %c3, %c0_18] : memref<1x28x28xf32, #tpu.memory_space<vmem>>, vector<1x24x28xf32>
    %18 = vector.shape_cast %17 : vector<1x24x28xf32> to vector<24x28xf32>
    %c3_19 = arith.constant 3 : index
    %c0_20 = arith.constant 0 : index
    %c0_21 = arith.constant 0 : index
    %19 = vector.load %arg2[%c3_19, %c0_20, %c0_21] : memref<5x28x240xf32, #tpu.memory_space<vmem>>, vector<1x28x240xf32>
    %20 = vector.shape_cast %19 : vector<1x28x240xf32> to vector<28x240xf32>
    %cst_22 = arith.constant dense<0.000000e+00> : vector<24x240xf32>
    %21 = tpu.matmul %18, %20, %cst_22 {dimension_numbers = #tpu.dot_dimension_numbers<[1], [0], [0], [1], [0, 0, 1, 1], [], []>} : vector<24x28xf32>, vector<28x240xf32>, vector<24x240xf32> -> vector<24x240xf32>
    %22 = arith.addf %16, %21 : vector<24x240xf32>
    %c0_23 = arith.constant 0 : index
    %c4 = arith.constant 4 : index
    %c0_24 = arith.constant 0 : index
    %23 = vector.load %arg1[%c0_23, %c4, %c0_24] : memref<1x28x28xf32, #tpu.memory_space<vmem>>, vector<1x24x28xf32>
    %24 = vector.shape_cast %23 : vector<1x24x28xf32> to vector<24x28xf32>
    %c4_25 = arith.constant 4 : index
    %c0_26 = arith.constant 0 : index
    %c0_27 = arith.constant 0 : index
    %25 = vector.load %arg2[%c4_25, %c0_26, %c0_27] : memref<5x28x240xf32, #tpu.memory_space<vmem>>, vector<1x28x240xf32>
    %26 = vector.shape_cast %25 : vector<1x28x240xf32> to vector<28x240xf32>
    %cst_28 = arith.constant dense<0.000000e+00> : vector<24x240xf32>
    %27 = tpu.matmul %24, %26, %cst_28 {dimension_numbers = #tpu.dot_dimension_numbers<[1], [0], [0], [1], [0, 0, 1, 1], [], []>} : vector<24x28xf32>, vector<28x240xf32>, vector<24x240xf32> -> vector<24x240xf32>
    %28 = arith.addf %22, %27 : vector<24x240xf32>
    %c0_29 = arith.constant 0 : index
    %c0_30 = arith.constant 0 : index
    %29 = vector.load %arg3[%c0_29, %c0_30] : memref<1x240xf32, #tpu.memory_space<vmem>>, vector<1x240xf32>
    %30 = vector.broadcast %29 : vector<1x240xf32> to vector<24x240xf32>
    %31 = arith.addf %28, %30 : vector<24x240xf32>
    %c0_31 = arith.constant 0 : index
    %c0_32 = arith.constant 0 : index
    %32 = vector.load %arg4[%c0_31, %c0_32] : memref<12x24xf32, #tpu.memory_space<vmem>>, vector<12x24xf32>
    %cst_33 = arith.constant dense<0.000000e+00> : vector<12x240xf32>
    %33 = tpu.matmul %32, %31, %cst_33 {dimension_numbers = #tpu.dot_dimension_numbers<[1], [0], [0], [1], [0, 0, 1, 1], [], []>} : vector<12x24xf32>, vector<24x240xf32>, vector<12x240xf32> -> vector<12x240xf32>
    %c0_34 = arith.constant 0 : index
    %c0_35 = arith.constant 0 : index
    %34 = vector.load %arg5[%c0_34, %c0_35] : memref<12x24xf32, #tpu.memory_space<vmem>>, vector<12x24xf32>
    %cst_36 = arith.constant dense<0.000000e+00> : vector<12x240xf32>
    %35 = tpu.matmul %34, %31, %cst_36 {dimension_numbers = #tpu.dot_dimension_numbers<[1], [0], [0], [1], [0, 0, 1, 1], [], []>} : vector<12x24xf32>, vector<24x240xf32>, vector<12x240xf32> -> vector<12x240xf32>
    %36 = arith.maximumf %33, %35 : vector<12x240xf32>
    %c0_37 = arith.constant 0 : index
    %c0_38 = arith.constant 0 : index
    %37 = vector.load %arg6[%c0_37, %c0_38] : memref<240x120xf32, #tpu.memory_space<vmem>>, vector<240x120xf32>
    %cst_39 = arith.constant dense<0.000000e+00> : vector<12x120xf32>
    %38 = tpu.matmul %36, %37, %cst_39 {dimension_numbers = #tpu.dot_dimension_numbers<[1], [0], [0], [1], [0, 0, 1, 1], [], []>} : vector<12x240xf32>, vector<240x120xf32>, vector<12x120xf32> -> vector<12x120xf32>
    %c0_40 = arith.constant 0 : index
    %c0_41 = arith.constant 0 : index
    %39 = vector.load %arg7[%c0_40, %c0_41] : memref<240x120xf32, #tpu.memory_space<vmem>>, vector<240x120xf32>
    %cst_42 = arith.constant dense<0.000000e+00> : vector<12x120xf32>
    %40 = tpu.matmul %36, %39, %cst_42 {dimension_numbers = #tpu.dot_dimension_numbers<[1], [0], [0], [1], [0, 0, 1, 1], [], []>} : vector<12x240xf32>, vector<240x120xf32>, vector<12x120xf32> -> vector<12x120xf32>
    %41 = arith.maximumf %38, %40 : vector<12x120xf32>
    %cst_43 = arith.constant 0.000000e+00 : f32
    %42 = vector.broadcast %cst_43 : f32 to vector<12x120xf32>
    %43 = arith.maximumf %41, %42 : vector<12x120xf32>
    %c0_44 = arith.constant 0 : index
    %c0_45 = arith.constant 0 : index
    %44 = vector.load %arg19[%c0_44, %c0_45] : memref<12x120xf32, #tpu.memory_space<vmem>>, vector<12x120xf32>
    tpu.vector_store %arg19[%c0_44, %c0_45], %43 {strides = array<i32>} : memref<12x120xf32, #tpu.memory_space<vmem>>, vector<12x120xf32>,
    %c0_46 = arith.constant 0 : index
    %c0_47 = arith.constant 0 : index
    %45 = vector.load %arg19[%c0_46, %c0_47] : memref<12x120xf32, #tpu.memory_space<vmem>>, vector<8x120xf32>
    %c0_48 = arith.constant 0 : index
    %c0_49 = arith.constant 0 : index
    %c0_50 = arith.constant 0 : index
    %46 = vector.load %arg8[%c0_48, %c0_49, %c0_50] : memref<5x120x160xf32, #tpu.memory_space<vmem>>, vector<1x120x160xf32>
    %47 = vector.shape_cast %46 : vector<1x120x160xf32> to vector<120x160xf32>
    %cst_51 = arith.constant dense<0.000000e+00> : vector<8x160xf32>
    %48 = tpu.matmul %45, %47, %cst_51 {dimension_numbers = #tpu.dot_dimension_numbers<[1], [0], [0], [1], [0, 0, 1, 1], [], []>} : vector<8x120xf32>, vector<120x160xf32>, vector<8x160xf32> -> vector<8x160xf32>
    %c1_52 = arith.constant 1 : index
    %c0_53 = arith.constant 0 : index
    %49 = vector.load %arg19[%c1_52, %c0_53] : memref<12x120xf32, #tpu.memory_space<vmem>>, vector<8x120xf32>
    %c1_54 = arith.constant 1 : index
    %c0_55 = arith.constant 0 : index
    %c0_56 = arith.constant 0 : index
    %50 = vector.load %arg8[%c1_54, %c0_55, %c0_56] : memref<5x120x160xf32, #tpu.memory_space<vmem>>, vector<1x120x160xf32>
    %51 = vector.shape_cast %50 : vector<1x120x160xf32> to vector<120x160xf32>
    %cst_57 = arith.constant dense<0.000000e+00> : vector<8x160xf32>
    %52 = tpu.matmul %49, %51, %cst_57 {dimension_numbers = #tpu.dot_dimension_numbers<[1], [0], [0], [1], [0, 0, 1, 1], [], []>} : vector<8x120xf32>, vector<120x160xf32>, vector<8x160xf32> -> vector<8x160xf32>
    %53 = arith.addf %48, %52 : vector<8x160xf32>
    %c2_58 = arith.constant 2 : index
    %c0_59 = arith.constant 0 : index
    %54 = vector.load %arg19[%c2_58, %c0_59] : memref<12x120xf32, #tpu.memory_space<vmem>>, vector<8x120xf32>
    %c2_60 = arith.constant 2 : index
    %c0_61 = arith.constant 0 : index
    %c0_62 = arith.constant 0 : index
    %55 = vector.load %arg8[%c2_60, %c0_61, %c0_62] : memref<5x120x160xf32, #tpu.memory_space<vmem>>, vector<1x120x160xf32>
    %56 = vector.shape_cast %55 : vector<1x120x160xf32> to vector<120x160xf32>
    %cst_63 = arith.constant dense<0.000000e+00> : vector<8x160xf32>
    %57 = tpu.matmul %54, %56, %cst_63 {dimension_numbers = #tpu.dot_dimension_numbers<[1], [0], [0], [1], [0, 0, 1, 1], [], []>} : vector<8x120xf32>, vector<120x160xf32>, vector<8x160xf32> -> vector<8x160xf32>
    %58 = arith.addf %53, %57 : vector<8x160xf32>
    %c3_64 = arith.constant 3 : index
    %c0_65 = arith.constant 0 : index
    %59 = vector.load %arg19[%c3_64, %c0_65] : memref<12x120xf32, #tpu.memory_space<vmem>>, vector<8x120xf32>
    %c3_66 = arith.constant 3 : index
    %c0_67 = arith.constant 0 : index
    %c0_68 = arith.constant 0 : index
    %60 = vector.load %arg8[%c3_66, %c0_67, %c0_68] : memref<5x120x160xf32, #tpu.memory_space<vmem>>, vector<1x120x160xf32>
    %61 = vector.shape_cast %60 : vector<1x120x160xf32> to vector<120x160xf32>
    %cst_69 = arith.constant dense<0.000000e+00> : vector<8x160xf32>
    %62 = tpu.matmul %59, %61, %cst_69 {dimension_numbers = #tpu.dot_dimension_numbers<[1], [0], [0], [1], [0, 0, 1, 1], [], []>} : vector<8x120xf32>, vector<120x160xf32>, vector<8x160xf32> -> vector<8x160xf32>
    %63 = arith.addf %58, %62 : vector<8x160xf32>
    %c4_70 = arith.constant 4 : index
    %c0_71 = arith.constant 0 : index
    %64 = vector.load %arg19[%c4_70, %c0_71] : memref<12x120xf32, #tpu.memory_space<vmem>>, vector<8x120xf32>
    %c4_72 = arith.constant 4 : index
    %c0_73 = arith.constant 0 : index
    %c0_74 = arith.constant 0 : index
    %65 = vector.load %arg8[%c4_72, %c0_73, %c0_74] : memref<5x120x160xf32, #tpu.memory_space<vmem>>, vector<1x120x160xf32>
    %66 = vector.shape_cast %65 : vector<1x120x160xf32> to vector<120x160xf32>
    %cst_75 = arith.constant dense<0.000000e+00> : vector<8x160xf32>
    %67 = tpu.matmul %64, %66, %cst_75 {dimension_numbers = #tpu.dot_dimension_numbers<[1], [0], [0], [1], [0, 0, 1, 1], [], []>} : vector<8x120xf32>, vector<120x160xf32>, vector<8x160xf32> -> vector<8x160xf32>
    %68 = arith.addf %63, %67 : vector<8x160xf32>
    %c0_76 = arith.constant 0 : index
    %c0_77 = arith.constant 0 : index
    %69 = vector.load %arg9[%c0_76, %c0_77] : memref<1x160xf32, #tpu.memory_space<vmem>>, vector<1x160xf32>
    %70 = vector.broadcast %69 : vector<1x160xf32> to vector<8x160xf32>
    %71 = arith.addf %68, %70 : vector<8x160xf32>
    %c0_78 = arith.constant 0 : index
    %c0_79 = arith.constant 0 : index
    %72 = vector.load %arg10[%c0_78, %c0_79] : memref<4x8xf32, #tpu.memory_space<vmem>>, vector<4x8xf32>
    %cst_80 = arith.constant dense<0.000000e+00> : vector<4x160xf32>
    %73 = tpu.matmul %72, %71, %cst_80 {dimension_numbers = #tpu.dot_dimension_numbers<[1], [0], [0], [1], [0, 0, 1, 1], [], []>} : vector<4x8xf32>, vector<8x160xf32>, vector<4x160xf32> -> vector<4x160xf32>
    %c0_81 = arith.constant 0 : index
    %c0_82 = arith.constant 0 : index
    %74 = vector.load %arg11[%c0_81, %c0_82] : memref<4x8xf32, #tpu.memory_space<vmem>>, vector<4x8xf32>
    %cst_83 = arith.constant dense<0.000000e+00> : vector<4x160xf32>
    %75 = tpu.matmul %74, %71, %cst_83 {dimension_numbers = #tpu.dot_dimension_numbers<[1], [0], [0], [1], [0, 0, 1, 1], [], []>} : vector<4x8xf32>, vector<8x160xf32>, vector<4x160xf32> -> vector<4x160xf32>
    %76 = arith.maximumf %73, %75 : vector<4x160xf32>
    %c0_84 = arith.constant 0 : index
    %c0_85 = arith.constant 0 : index
    %77 = vector.load %arg12[%c0_84, %c0_85] : memref<160x80xf32, #tpu.memory_space<vmem>>, vector<160x80xf32>
    %cst_86 = arith.constant dense<0.000000e+00> : vector<4x80xf32>
    %78 = tpu.matmul %76, %77, %cst_86 {dimension_numbers = #tpu.dot_dimension_numbers<[1], [0], [0], [1], [0, 0, 1, 1], [], []>} : vector<4x160xf32>, vector<160x80xf32>, vector<4x80xf32> -> vector<4x80xf32>
    %c0_87 = arith.constant 0 : index
    %c0_88 = arith.constant 0 : index
    %79 = vector.load %arg13[%c0_87, %c0_88] : memref<160x80xf32, #tpu.memory_space<vmem>>, vector<160x80xf32>
    %cst_89 = arith.constant dense<0.000000e+00> : vector<4x80xf32>
    %80 = tpu.matmul %76, %79, %cst_89 {dimension_numbers = #tpu.dot_dimension_numbers<[1], [0], [0], [1], [0, 0, 1, 1], [], []>} : vector<4x160xf32>, vector<160x80xf32>, vector<4x80xf32> -> vector<4x80xf32>
    %81 = arith.maximumf %78, %80 : vector<4x80xf32>
    %cst_90 = arith.constant 0.000000e+00 : f32
    %82 = vector.broadcast %cst_90 : f32 to vector<4x80xf32>
    %83 = arith.maximumf %81, %82 : vector<4x80xf32>
    %c0_91 = arith.constant 0 : index
    %c0_92 = arith.constant 0 : index
    %84 = vector.load %arg20[%c0_91, %c0_92] : memref<4x80xf32, #tpu.memory_space<vmem>>, vector<4x80xf32>
    tpu.vector_store %arg20[%c0_91, %c0_92], %83 {strides = array<i32>} : memref<4x80xf32, #tpu.memory_space<vmem>>, vector<4x80xf32>,
    %c0_93 = arith.constant 0 : index
    %c0_94 = arith.constant 0 : index
    %85 = vector.load %arg15[%c0_93, %c0_94] : memref<1x50xf32, #tpu.memory_space<vmem>>, vector<1x50xf32>
    %c0_95 = arith.constant 0 : index
    %c0_96 = arith.constant 0 : index
    %86 = vector.load %arg20[%c0_95, %c0_96] : memref<4x80xf32, #tpu.memory_space<vmem>>, vector<1x80xf32>
    %c0_97 = arith.constant 0 : index
    %c0_98 = arith.constant 0 : index
    %c0_99 = arith.constant 0 : index
    %87 = vector.load %arg14[%c0_97, %c0_98, %c0_99] : memref<4x80x50xf32, #tpu.memory_space<vmem>>, vector<1x80x50xf32>
    %88 = vector.shape_cast %87 : vector<1x80x50xf32> to vector<80x50xf32>
    %cst_100 = arith.constant dense<0.000000e+00> : vector<1x50xf32>
    %89 = tpu.matmul %86, %88, %cst_100 {dimension_numbers = #tpu.dot_dimension_numbers<[1], [0], [0], [1], [0, 0, 1, 1], [], []>} : vector<1x80xf32>, vector<80x50xf32>, vector<1x50xf32> -> vector<1x50xf32>
    %90 = arith.addf %85, %89 : vector<1x50xf32>
    %c1_101 = arith.constant 1 : index
    %c0_102 = arith.constant 0 : index
    %91 = vector.load %arg20[%c1_101, %c0_102] : memref<4x80xf32, #tpu.memory_space<vmem>>, vector<1x80xf32>
    %c1_103 = arith.constant 1 : index
    %c0_104 = arith.constant 0 : index
    %c0_105 = arith.constant 0 : index
    %92 = vector.load %arg14[%c1_103, %c0_104, %c0_105] : memref<4x80x50xf32, #tpu.memory_space<vmem>>, vector<1x80x50xf32>
    %93 = vector.shape_cast %92 : vector<1x80x50xf32> to vector<80x50xf32>
    %cst_106 = arith.constant dense<0.000000e+00> : vector<1x50xf32>
    %94 = tpu.matmul %91, %93, %cst_106 {dimension_numbers = #tpu.dot_dimension_numbers<[1], [0], [0], [1], [0, 0, 1, 1], [], []>} : vector<1x80xf32>, vector<80x50xf32>, vector<1x50xf32> -> vector<1x50xf32>
    %95 = arith.addf %90, %94 : vector<1x50xf32>
    %c2_107 = arith.constant 2 : index
    %c0_108 = arith.constant 0 : index
    %96 = vector.load %arg20[%c2_107, %c0_108] : memref<4x80xf32, #tpu.memory_space<vmem>>, vector<1x80xf32>
    %c2_109 = arith.constant 2 : index
    %c0_110 = arith.constant 0 : index
    %c0_111 = arith.constant 0 : index
    %97 = vector.load %arg14[%c2_109, %c0_110, %c0_111] : memref<4x80x50xf32, #tpu.memory_space<vmem>>, vector<1x80x50xf32>
    %98 = vector.shape_cast %97 : vector<1x80x50xf32> to vector<80x50xf32>
    %cst_112 = arith.constant dense<0.000000e+00> : vector<1x50xf32>
    %99 = tpu.matmul %96, %98, %cst_112 {dimension_numbers = #tpu.dot_dimension_numbers<[1], [0], [0], [1], [0, 0, 1, 1], [], []>} : vector<1x80xf32>, vector<80x50xf32>, vector<1x50xf32> -> vector<1x50xf32>
    %100 = arith.addf %95, %99 : vector<1x50xf32>
    %c3_113 = arith.constant 3 : index
    %c0_114 = arith.constant 0 : index
    %101 = vector.load %arg20[%c3_113, %c0_114] : memref<4x80xf32, #tpu.memory_space<vmem>>, vector<1x80xf32>
    %c3_115 = arith.constant 3 : index
    %c0_116 = arith.constant 0 : index
    %c0_117 = arith.constant 0 : index
    %102 = vector.load %arg14[%c3_115, %c0_116, %c0_117] : memref<4x80x50xf32, #tpu.memory_space<vmem>>, vector<1x80x50xf32>
    %103 = vector.shape_cast %102 : vector<1x80x50xf32> to vector<80x50xf32>
    %cst_118 = arith.constant dense<0.000000e+00> : vector<1x50xf32>
    %104 = tpu.matmul %101, %103, %cst_118 {dimension_numbers = #tpu.dot_dimension_numbers<[1], [0], [0], [1], [0, 0, 1, 1], [], []>} : vector<1x80xf32>, vector<80x50xf32>, vector<1x50xf32> -> vector<1x50xf32>
    %105 = arith.addf %100, %104 : vector<1x50xf32>
    %cst_119 = arith.constant 0.000000e+00 : f32
    %106 = vector.broadcast %cst_119 : f32 to vector<1x50xf32>
    %107 = arith.maximumf %105, %106 : vector<1x50xf32>
    %c0_120 = arith.constant 0 : index
    %c0_121 = arith.constant 0 : index
    %108 = vector.load %arg16[%c0_120, %c0_121] : memref<50x10xf32, #tpu.memory_space<vmem>>, vector<50x10xf32>
    %cst_122 = arith.constant dense<0.000000e+00> : vector<1x10xf32>
    %109 = tpu.matmul %107, %108, %cst_122 {dimension_numbers = #tpu.dot_dimension_numbers<[1], [0], [0], [1], [0, 0, 1, 1], [], []>} : vector<1x50xf32>, vector<50x10xf32>, vector<1x10xf32> -> vector<1x10xf32>
    %c0_123 = arith.constant 0 : index
    %c0_124 = arith.constant 0 : index
    %110 = vector.load %arg17[%c0_123, %c0_124] : memref<1x10xf32, #tpu.memory_space<vmem>>, vector<1x10xf32>
    %111 = arith.addf %109, %110 : vector<1x10xf32>
    %c0_125 = arith.constant 0 : index
    %c0_126 = arith.constant 0 : index
    %c0_127 = arith.constant 0 : index
    %112 = vector.load %arg18[%c0_125, %c0_126, %c0_127] : memref<1x1x10xf32, #tpu.memory_space<vmem>>, vector<1x1x10xf32>
    %113 = vector.shape_cast %112 : vector<1x1x10xf32> to vector<1x10xf32>
    %114 = vector.shape_cast %111 : vector<1x10xf32> to vector<1x1x10xf32>
    tpu.vector_store %arg18[%c0_125, %c0_126, %c0_127], %114 {strides = array<i32>} : memref<1x1x10xf32, #tpu.memory_space<vmem>>, vector<1x1x10xf32>,
    return
  }
  func.func @transform_0(%arg0: i32) -> (i32, i32, i32) {
    %c0_i32 = arith.constant 0 : i32
    %c0_i32_0 = arith.constant 0 : i32
    %c0_i32_1 = arith.constant 0 : i32
    return %arg0, %c0_i32, %c0_i32_0 : i32, i32, i32
  }
  func.func @transform_1(%arg0: i32) -> (i32, i32, i32) {
    %c0_i32 = arith.constant 0 : i32
    %c0_i32_0 = arith.constant 0 : i32
    %c0_i32_1 = arith.constant 0 : i32
    %c0_i32_2 = arith.constant 0 : i32
    return %c0_i32, %c0_i32_0, %c0_i32_1 : i32, i32, i32
  }
  func.func @transform_2(%arg0: i32) -> (i32, i32) {
    %c0_i32 = arith.constant 0 : i32
    %c0_i32_0 = arith.constant 0 : i32
    %c0_i32_1 = arith.constant 0 : i32
    return %c0_i32, %c0_i32_0 : i32, i32
  }
  func.func @transform_3(%arg0: i32) -> (i32, i32) {
    %c0_i32 = arith.constant 0 : i32
    %c0_i32_0 = arith.constant 0 : i32
    %c0_i32_1 = arith.constant 0 : i32
    return %c0_i32, %c0_i32_0 : i32, i32
  }
  func.func @transform_4(%arg0: i32) -> (i32, i32) {
    %c0_i32 = arith.constant 0 : i32
    %c0_i32_0 = arith.constant 0 : i32
    %c0_i32_1 = arith.constant 0 : i32
    return %c0_i32, %c0_i32_0 : i32, i32
  }
  func.func @transform_5(%arg0: i32) -> (i32, i32) {
    %c0_i32 = arith.constant 0 : i32
    %c0_i32_0 = arith.constant 0 : i32
    %c0_i32_1 = arith.constant 0 : i32
    return %c0_i32, %c0_i32_0 : i32, i32
  }
  func.func @transform_6(%arg0: i32) -> (i32, i32) {
    %c0_i32 = arith.constant 0 : i32
    %c0_i32_0 = arith.constant 0 : i32
    %c0_i32_1 = arith.constant 0 : i32
    return %c0_i32, %c0_i32_0 : i32, i32
  }
  func.func @transform_7(%arg0: i32) -> (i32, i32, i32) {
    %c0_i32 = arith.constant 0 : i32
    %c0_i32_0 = arith.constant 0 : i32
    %c0_i32_1 = arith.constant 0 : i32
    %c0_i32_2 = arith.constant 0 : i32
    return %c0_i32, %c0_i32_0, %c0_i32_1 : i32, i32, i32
  }
  func.func @transform_8(%arg0: i32) -> (i32, i32) {
    %c0_i32 = arith.constant 0 : i32
    %c0_i32_0 = arith.constant 0 : i32
    %c0_i32_1 = arith.constant 0 : i32
    return %c0_i32, %c0_i32_0 : i32, i32
  }
  func.func @transform_9(%arg0: i32) -> (i32, i32) {
    %c0_i32 = arith.constant 0 : i32
    %c0_i32_0 = arith.constant 0 : i32
    %c0_i32_1 = arith.constant 0 : i32
    return %c0_i32, %c0_i32_0 : i32, i32
  }
  func.func @transform_10(%arg0: i32) -> (i32, i32) {
    %c0_i32 = arith.constant 0 : i32
    %c0_i32_0 = arith.constant 0 : i32
    %c0_i32_1 = arith.constant 0 : i32
    return %c0_i32, %c0_i32_0 : i32, i32
  }
  func.func @transform_11(%arg0: i32) -> (i32, i32) {
    %c0_i32 = arith.constant 0 : i32
    %c0_i32_0 = arith.constant 0 : i32
    %c0_i32_1 = arith.constant 0 : i32
    return %c0_i32, %c0_i32_0 : i32, i32
  }
  func.func @transform_12(%arg0: i32) -> (i32, i32) {
    %c0_i32 = arith.constant 0 : i32
    %c0_i32_0 = arith.constant 0 : i32
    %c0_i32_1 = arith.constant 0 : i32
    return %c0_i32, %c0_i32_0 : i32, i32
  }
  func.func @transform_13(%arg0: i32) -> (i32, i32, i32) {
    %c0_i32 = arith.constant 0 : i32
    %c0_i32_0 = arith.constant 0 : i32
    %c0_i32_1 = arith.constant 0 : i32
    %c0_i32_2 = arith.constant 0 : i32
    return %c0_i32, %c0_i32_0, %c0_i32_1 : i32, i32, i32
  }
  func.func @transform_14(%arg0: i32) -> (i32, i32) {
    %c0_i32 = arith.constant 0 : i32
    %c0_i32_0 = arith.constant 0 : i32
    %c0_i32_1 = arith.constant 0 : i32
    return %c0_i32, %c0_i32_0 : i32, i32
  }
  func.func @transform_15(%arg0: i32) -> (i32, i32) {
    %c0_i32 = arith.constant 0 : i32
    %c0_i32_0 = arith.constant 0 : i32
    %c0_i32_1 = arith.constant 0 : i32
    return %c0_i32, %c0_i32_0 : i32, i32
  }
  func.func @transform_16(%arg0: i32) -> (i32, i32) {
    %c0_i32 = arith.constant 0 : i32
    %c0_i32_0 = arith.constant 0 : i32
    %c0_i32_1 = arith.constant 0 : i32
    return %c0_i32, %c0_i32_0 : i32, i32
  }
  func.func @transform_17(%arg0: i32) -> (i32, i32, i32) {
    %c0_i32 = arith.constant 0 : i32
    %c0_i32_0 = arith.constant 0 : i32
    %c0_i32_1 = arith.constant 0 : i32
    return %arg0, %c0_i32, %c0_i32_0 : i32, i32, i32
  }
}

</mosaic_0001>

<bundles_post_ra>
// kernel: cnn_forward.1
= control target key start
LH: loop header
LB: loop body
LE: loop exit
PB: predicated region body
PF: predicated region fallthrough
CT: control target
= control target key end

     0   :  { %s4911_s0 = inlined_call_operand.vmem [shape: f32[2,28,28], index: 0, kind: input, shape index: {}]   ;;  %s4912_s1 = inlined_call_operand.vmem [shape: f32[5,28,240], index: 1, kind: input, shape index: {}]   ;;  %s4913_s2 = inlined_call_operand.vmem [shape: f32[1,240], index: 2, kind: input, shape index: {}]   ;;  %s4914_s3 = inlined_call_operand.vmem [shape: f32[12,24], index: 3, kind: input, shape index: {}]   ;;  %s4915_s4 = inlined_call_operand.vmem [shape: f32[12,24], index: 4, kind: input, shape index: {}]   ;;  %s4916_s5 = inlined_call_operand.vmem [shape: f32[240,120], index: 5, kind: input, shape index: {}]   ;;  %s4917_s6 = inlined_call_operand.vmem [shape: f32[240,120], index: 6, kind: input, shape index: {}]   ;;  %s4918_s7 = inlined_call_operand.vmem [shape: f32[5,120,160], index: 7, kind: input, shape index: {}]   ;;  %s4919_s8 = inlined_call_operand.vmem [shape: f32[1,160], index: 8, kind: input, shape index: {}]   ;;  %s4920_s9 = inlined_call_operand.vmem [shape: f32[4,8], index: 9, kind: input, shape index: {}]   ;;  %s4921_s10 = inlined_call_operand.vmem [shape: f32[4,8], index: 10, kind: input, shape index: {}]   ;;  %s4922_s11 = inlined_call_operand.vmem [shape: f32[160,80], index: 11, kind: input, shape index: {}]   ;;  %s4923_s12 = inlined_call_operand.vmem [shape: f32[160,80], index: 12, kind: input, shape index: {}]   ;;  %s4924_s13 = inlined_call_operand.vmem [shape: f32[4,80,50], index: 13, kind: input, shape index: {}]   ;;  %s4925_s14 = inlined_call_operand.vmem [shape: f32[1,50], index: 14, kind: input, shape index: {}]   ;;  %s4926_s15 = inlined_call_operand.vmem [shape: f32[50,10], index: 15, kind: input, shape index: {}]   ;;  %s4927_s16 = inlined_call_operand.vmem [shape: f32[1,10], index: 16, kind: input, shape index: {}]   ;;  %s4928_s17 = inlined_call_operand.hbm [shape: f32[2,1,10], index: 17, kind: output, shape index: {}]  }
   0x1   :  { %4935 = sst [smem:[#allocation12_spill]] %s4911_s0 }
   0x2   :  { %4936 = sst [smem:[#allocation13_spill]] %s4912_s1 }
   0x3   :  { %4937 = sst [smem:[#allocation14_spill]] %s4913_s2 }
   0x4   :  { %22 = vsyncpa [#allocation5], 0 }
   0x5   :  { %24 = vsyncpa [#allocation5 + $0x1], 0  ;;  %s3522_s24 = smov 0   ;;  %s3524_s25 = smov 0  }
   0x6   :  { %s3526_s26 = smov 0   ;;  %s3528_s27 = smov 0  }
   0x7 LB: > { %4938 = sst [smem:[#allocation7_spill]] %s3415_s24  ;;  %s3543_s28 = sadd.s32 4294967295, %s3427_s27   ;;  %s3427_s27 = sphi %s3528_s27, %s4950_s27   ;;  %s3423_s26 = sphi %s3526_s26, %s4952_s26   ;;  %s3419_s25 = sphi %s3524_s25, %s4954_s25   ;;  %s3415_s24 = sphi %s3522_s24, %s4953_s24  }
   0x8   : > { %4939 = sst [smem:[#allocation8_spill]] %s3423_s26  ;;  %s2925_s29 = sadd.s32 4294967294, %s3427_s27  }
   0x9   : > { %s3547_s0 = sadd.s32 1, %s3427_s27   ;;  %s399_s30 = sadd.s32 1, %s3423_s26 }
   0xa   : > { %4940 = sst [smem:[#allocation9_spill]] %s3547_s0  ;;  %s396_s18 = ssub.s32 %s3427_s27, %s3547_s0 }
   0xb   : > { %p409_p0 = scmp.ne.s32.totalorder %s3423_s26, %s3419_s25  ;;  %p397_p1 = scmp.eq.s32.totalorder %s396_s18, 0 }
   0xc   : > { %p410_p2 = scmp.eq.s32.totalorder %s3543_s28, 1  ;;  %p415_p3 = scmp.ne.s32.totalorder %s3419_s25, %s3415_s24 }
   0xd   : > { %p416_p4 = scmp.eq.s32.totalorder %s2925_s29, 1  ;;  %p2928_p7 = scmp.ge.s32.totalorder %s3427_s27, 1 }
   0xe   : > { %s3558_s19 = scalar_select %p397_p1, %s3423_s26, %s399_s30  }
   0xf   : > { %p3560_p5 = por %p410_p2, %p409_p0  ;;  %p3564_p6 = por %p416_p4, %p415_p3 }
  0x10   : > { %4941 = sst [smem:[#allocation10_spill]] %s3558_s19  ;;  %p490_p8 = scmp.lt.s32.totalorder %s3427_s27, 3 }
  0x11   : > { %s4943_s20 = scalar_select %p3564_p6, 1, 0 }
  0x12   : > { %p491_p9 = pnand %p2928_p7, %p490_p8 }
  0x13   : > { %4944 = sst [smem:[#allocation11_spill]] %s4943_s20  ;;  %p541_p10 = scmp.lt.s32.totalorder (!%p491_p9), %s3543_s28, 1 }
  0x14   : > { %494 = sbr.rel (%p491_p9) target bundleno = 1784 (0x6f8), region = 88  ;;  %s4945_s23 = sld [smem:[#allocation13_spill]] (!%p491_p9) }
  0x15   : > { %s4946_s0 = sld [smem:[#allocation12_spill]] (!%p491_p9) }
  0x16   : > { %s4947_s2 = sld [smem:[#allocation14_spill]] (!%p491_p9) }
  0x19   : > { %vm579_vm0 = vcmask 1043456   ;;  %s542_s24 = scalar_select %p541_p10, %s3543_s28, 1  ;;  %vm569_vm1 = vcmask 228352   ;;  %v3429_v16 = vmov 0.0   ;;  %v1323_v56 = vld [vmem:[%s4916_s5 + $0x78] sm:$0xff]  ;;  %v1322_v57 = vld [vmem:[%s4916_s5 + $0x70] sm:$0xff] }
  0x1a   : > { %v2938_v0 = vld [vmem:[%s4945_s23 + $0x78] sm:$0xf]  ;;  %v2936_v2 = vld [vmem:[%s4945_s23 + $0x68] sm:$0xff]  ;;  %v2937_v3 = vld [vmem:[%s4945_s23 + $0x70] sm:$0xf]  ;;  %650 = vmatprep.mubr.f32.mxu0 %v3429_v16  ;;  %748 = vmatprep.mubr.f32.mxu1 %v3429_v16  ;;  %vm1135_vm2 = vcmask 195584  }
  0x1b   : > { %v556_v1 = vld [vmem:[%s4945_s23 + $0x38] sm:$0xf]  ;;  %2939 = vmatprep.subr.msk.mxu0 %vm579_vm0, %v2938_v0  ;;  %v555_v4 = vld [vmem:[%s4945_s23 + $0x30] sm:$0xf]  ;;  %v554_v5 = vld [vmem:[%s4945_s23 + $0x28] sm:$0xff]  ;;  %s3164_s29 = sshll.u32 %s542_s24, 5 }
  0x1c   : > { %2944 = vmatprep.subr.msk.mxu1 %vm579_vm0, %v556_v1  ;;  %2940 = vmatpush1.msk.msra.mxu0 %vm579_vm0, %v2937_v3  ;;  %v2935_v6 = vld [vmem:[%s4945_s23 + $0x60] sm:$0xff]  ;;  %v2934_v8 = vld [vmem:[%s4945_s23 + $0x58] sm:$0xff]  ;;  %v2933_v10 = vld [vmem:[%s4945_s23 + $0x50] sm:$0xff]  ;;  %s3627_s18 = scalar_lea.vmem %s4946_s0, %s3164_s29  ;;  %vm1338_vm3 = vcmask 916480   ;;  %vm1529_vm4 = vcmask 982016   ;;  %vm1531_vm5 = vcmask 977920  }
  0x1d   : > { %2945 = vmatpush1.msk.msra.mxu1 %vm579_vm0, %v555_v4  ;;  %v553_v7 = vld [vmem:[%s4945_s23 + $0x20] sm:$0xff]  ;;  %612 = vmatprep.subr.mxu0 %v2936_v2  ;;  %v552_v9 = vld [vmem:[%s4945_s23 + $0x18] sm:$0xff]  ;;  %v551_v11 = vld [vmem:[%s4945_s23 + $0x10] sm:$0xff]  ;;  %vm2083_vm6 = vcmask 64512   ;;  %vm2255_vm7 = vcmask 261120   ;;  %vm3430_vm8 = vmmov 0  }
  0x1e   : > { %710 = vmatprep.subr.mxu1 %v554_v5  ;;  %613 = vmatpush1.msra.mxu0 %v2935_v6  ;;  %v2932_v12 = vld [vmem:[%s4945_s23 + $0x48] sm:$0xff]  ;;  %v2931_v14 = vld [vmem:[%s4945_s23 + $0x40] sm:$0xff]  ;;  %v2956_v19 = vld [vmem:[%s4945_s23 + $0xb8] sm:$0xf]  ;;  %vm2421_vm9 = vcmask 650240   ;;  %vm2435_vm10 = vcmask 654336  }
  0x1f   : > { %711 = vmatpush1.msra.mxu1 %v553_v7  ;;  %v550_v13 = vld [vmem:[%s4945_s23 + $0x8] sm:$0xff]  ;;  %614 = vmatprep.subr.mxu0 %v2934_v8  ;;  %v549_v15 = vld [vmem:[%s4945_s23] sm:$0xff]  ;;  %v2969_v20 = vld [vmem:[%s4945_s23 + $0xf8] sm:$0xf]  ;;  %vm2781_vm11 = vcmask 1041408   ;;  %vm2777_vm12 = vcmask 408576  }
  0x20   : > { %712 = vmatprep.subr.mxu1 %v552_v9  ;;  %615 = vmatpush1.msra.mxu0 %v2933_v10  ;;  %v557_v17 = vld [vmem:[%s3627_s18 + $0x1] sm:$0xff]  ;;  %v2955_v21 = vld [vmem:[%s4945_s23 + $0xb0] sm:$0xf]  ;;  %v2952_v27 = vld [vmem:[%s4945_s23 + $0x98] sm:$0xff]  ;;  %s539_s29 = sand.u32 1, %s3419_s25   ;;  %s3161_s0 = sshll.u32 %s3543_s28, 4 }
  0x21   : > { %713 = vmatpush1.msra.mxu1 %v551_v11  ;;  %616 = vmatprep.subr.mxu0 %v2932_v12  ;;  %v546_v18 = vld [vmem:[%s3627_s18] sm:$0xff]  ;;  %v2968_v22 = vld [vmem:[%s4945_s23 + $0xf0] sm:$0xf]  ;;  %v547_v24 = vld [vmem:[%s3627_s18 + $0x8] sm:$0xff]  ;;  %vm2855_vm13 = vcmask 73728   ;;  %s4876_s22 = scalar_lea.hbm %s4928_s17, %s3161_s0  ;;  %s2858_s19 = scalar_lea.sflag [#allocation5], %s539_s29 }
  0x22   : > { %714 = vmatprep.subr.mxu1 %v550_v13  ;;  %617 = vmatpush1.msra.mxu0 %v2931_v14  ;;  %v558_v23 = vld [vmem:[%s3627_s18 + $0x9] sm:$0xff]  ;;  %v2953_v26 = vld [vmem:[%s4945_s23 + $0xa0] sm:$0xff]  ;;  %v559_v29 = vld [vmem:[%s3627_s18 + $0x11] sm:$0xff]  ;;  %s3431_s28 = smov [#allocation4]  }
  0x23   : > { %715 = vmatpush1.msra.mxu1 %v549_v15  ;;  %2941 = vmatmul.mubr.msk.f32.vlgmr.msra.gmra.mxu0 %vm569_vm1, %v557_v17  ;;  %v2954_v25 = vld [vmem:[%s4945_s23 + $0xa8] sm:$0xff]  ;;  %v548_v30 = vld [vmem:[%s3627_s18 + $0x10] sm:$0xff]  ;;  %v2966_v32 = vld [vmem:[%s4945_s23 + $0xe0] sm:$0xff]  ;;  %s3371_s30 = sshll.u32 %s3431_s28, 4  ;;  %s3372_s30 = int_to_ptr.vmem [resolvable:$false] %s3371_s30 }
  0x24   : > { %2946 = vmatmul.mubr.msk.f32.vlgmr.msra.gmra.mxu1 %vm569_vm1, %v546_v18  ;;  %656 = vmatprep.mubr.f32.mxu0 %v3429_v16  ;;  %v2967_v28 = vld [vmem:[%s4945_s23 + $0xe8] sm:$0xff]  ;;  %v2951_v31 = vld [vmem:[%s4945_s23 + $0x90] sm:$0xff]  ;;  %v2965_v34 = vld [vmem:[%s4945_s23 + $0xd8] sm:$0xff]  ;;  %s3373_s26 = scalar_lea.vmem %s3372_s30, 32 }
  0x25   : > { %754 = vmatprep.mubr.f32.mxu1 %v3429_v16  ;;  %2957 = vmatprep.subr.msk.mxu0 %vm579_vm0, %v2956_v19  ;;  %v2950_v33 = vld [vmem:[%s4945_s23 + $0x88] sm:$0xff]  ;;  %v2949_v35 = vld [vmem:[%s4945_s23 + $0x80] sm:$0xff]  ;;  %v2964_v36 = vld [vmem:[%s4945_s23 + $0xd0] sm:$0xff] }
  0x26   : > { %2970 = vmatprep.subr.msk.mxu1 %vm579_vm0, %v2969_v20  ;;  %2958 = vmatpush1.msk.msra.mxu0 %vm579_vm0, %v2955_v21  ;;  %v767_v37 = vld [vmem:[%s3627_s18 + $0x2] sm:$0xff]  ;;  %v2982_v41 = vld [vmem:[%s4945_s23 + $0x138] sm:$0xf]  ;;  %v768_v42 = vld [vmem:[%s3627_s18 + $0xa] sm:$0xff] }
  0x27   : > { %2971 = vmatpush1.msk.msra.mxu1 %vm579_vm0, %v2968_v22  ;;  %2942 = vmatmul.mubr.msk.f32.gmra.mxu0 %vm569_vm1, %v558_v23  ;;  %v2963_v38 = vld [vmem:[%s4945_s23 + $0xc8] sm:$0xff]  ;;  %v2962_v39 = vld [vmem:[%s4945_s23 + $0xc0] sm:$0xff]  ;;  %v2981_v43 = vld [vmem:[%s4945_s23 + $0x130] sm:$0xf] }
  0x28   : > { %2947 = vmatmul.mubr.msk.f32.gmra.mxu1 %vm569_vm1, %v547_v24  ;;  %820 = vmatprep.subr.mxu0 %v2954_v25  ;;  %v883_v40 = vld [vmem:[%s3627_s18 + $0x3] sm:$0xff]  ;;  %v884_v45 = vld [vmem:[%s3627_s18 + $0xb] sm:$0xff]  ;;  %v2978_v48 = vld [vmem:[%s4945_s23 + $0x118] sm:$0xff] }
  0x29   : > { %662 = vmatprep.mubr.f32.mxu0 %v3429_v16  ;;  %760 = vmatprep.mubr.f32.mxu1 %v3429_v16  ;;  %v2980_v44 = vld [vmem:[%s4945_s23 + $0x128] sm:$0xff]  ;;  %v2979_v46 = vld [vmem:[%s4945_s23 + $0x120] sm:$0xff]  ;;  %v769_v47 = vld [vmem:[%s3627_s18 + $0x12] sm:$0xff] }
  0x2a   : > { %821 = vmatpush1.msra.mxu0 %v2953_v26  ;;  %936 = vmatprep.subr.mxu1 %v2967_v28  ;;  %v2977_v49 = vld [vmem:[%s4945_s23 + $0x110] sm:$0xff]  ;;  %v2976_v50 = vld [vmem:[%s4945_s23 + $0x108] sm:$0xff]  ;;  %v2975_v52 = vld [vmem:[%s4945_s23 + $0x100] sm:$0xff] }
  0x2b   : > { %822 = vmatprep.subr.mxu0 %v2952_v27  ;;  %2943 = vmatmul.mubr.msk.f32.gmra.mxu0 %vm569_vm1, %v559_v29  ;;  %v885_v51 = vld [vmem:[%s3627_s18 + $0x13] sm:$0xff]  ;;  %v999_v53 = vld [vmem:[%s3627_s18 + $0x4] sm:$0xff] }
  0x2c   : > { %2948 = vmatmul.mubr.msk.f32.gmra.mxu1 %vm569_vm1, %v548_v30  ;;  %823 = vmatpush1.msra.mxu0 %v2951_v31  ;;  %v1000_v54 = vld [vmem:[%s3627_s18 + $0xc] sm:$0xff]  ;;  %v1001_v55 = vld [vmem:[%s3627_s18 + $0x14] sm:$0xff]  ;;  %v1320_v59 = vld [vmem:[%s4916_s5 + $0x60] sm:$0xff]  ;;  %s540_s18 = scalar_lea.vmem [#allocation4], %s539_s29 }
  0x2d   : > { %937 = vmatpush1.msra.mxu1 %v2966_v32  ;;  %824 = vmatprep.subr.mxu0 %v2950_v33  ;;  %v1321_v58 = vld [vmem:[%s4916_s5 + $0x68] sm:$0xff]  ;;  %v1319_v60 = vld [vmem:[%s4916_s5 + $0x58] sm:$0xff]  ;;  %v1318_v61 = vld [vmem:[%s4916_s5 + $0x50] sm:$0xff]  ;;  %s2870_s24 = sshll.u32 %s540_s18, 4  ;;  %s2871_s24 = int_to_ptr.vmem [resolvable:$true] %s2870_s24 }
  0x2e   : > { %938 = vmatprep.subr.mxu1 %v2965_v34  ;;  %825 = vmatpush1.msra.mxu0 %v2949_v35  ;;  %v1317_v62 = vld [vmem:[%s4916_s5 + $0x48] sm:$0xff]  ;;  %v1316_v63 = vld [vmem:[%s4916_s5 + $0x40] sm:$0xff]  ;;  %v1315_v0 = vld [vmem:[%s4916_s5 + $0x38] sm:$0xff]  ;;  %p3374_p0 = scmp.lt.s32.totalorder %s2871_s24, %s3372_s30 }
  0x2f   : > { %858 = vmatprep.mubr.f32.mxu0 %v3429_v16  ;;  %939 = vmatpush1.msra.mxu1 %v2964_v36  ;;  %v1314_v1 = vld [vmem:[%s4916_s5 + $0x30] sm:$0xff]  ;;  %v1313_v2 = vld [vmem:[%s4916_s5 + $0x28] sm:$0xff]  ;;  %v1312_v3 = vld [vmem:[%s4916_s5 + $0x20] sm:$0xff] }
  0x30   : > { %2959 = vmatmul.mubr.msk.f32.vlgmr.msra.gmra.mxu0 %vm569_vm1, %v767_v37  ;;  %940 = vmatprep.subr.mxu1 %v2963_v38  ;;  %v1311_v4 = vld [vmem:[%s4916_s5 + $0x18] sm:$0xff]  ;;  %v1310_v5 = vld [vmem:[%s4916_s5 + $0x10] sm:$0xff]  ;;  %v1309_v6 = vld [vmem:[%s4916_s5 + $0x8] sm:$0xff] }
  0x31   : > { %974 = vmatprep.mubr.f32.mxu1 %v3429_v16  ;;  %941 = vmatpush1.msra.mxu1 %v2962_v39  ;;  %v1308_v7 = vld [vmem:[%s4916_s5] sm:$0xff]  ;;  %v1337_v8 = vld [vmem:[%s4916_s5 + $0xe8] sm:$0xff]  ;;  %v1335_v10 = vld [vmem:[%s4916_s5 + $0xd8] sm:$0xff]  ;;  %v1117_v39 = vlaneseq }
  0x32   : > { %864 = vmatprep.mubr.f32.mxu0 %v3429_v16  ;;  %2972 = vmatmul.mubr.msk.f32.vlgmr.msra.gmra.mxu1 %vm569_vm1, %v883_v40  ;;  %v1336_v9 = vld [vmem:[%s4916_s5 + $0xe0] sm:$0xff]  ;;  %v1334_v11 = vld [vmem:[%s4916_s5 + $0xd0] sm:$0xff]  ;;  %v1333_v12 = vld [vmem:[%s4916_s5 + $0xc8] sm:$0xff] }
  0x33   : > { %2983 = vmatprep.subr.msk.mxu0 %vm579_vm0, %v2982_v41  ;;  %980 = vmatprep.mubr.f32.mxu1 %v3429_v16  ;;  %v1332_v13 = vld [vmem:[%s4916_s5 + $0xc0] sm:$0xff]  ;;  %v1331_v14 = vld [vmem:[%s4916_s5 + $0xb8] sm:$0xff] }
  0x34   : > { %2960 = vmatmul.mubr.msk.f32.gmra.mxu0 %vm569_vm1, %v768_v42 }
  0x35   : > { %2984 = vmatpush1.msk.msra.mxu0 %vm579_vm0, %v2981_v43  ;;  %870 = vmatprep.mubr.f32.mxu0 %v3429_v16 }
  0x36   : > { %1052 = vmatprep.subr.mxu0 %v2980_v44  ;;  %2973 = vmatmul.mubr.msk.f32.gmra.mxu1 %vm569_vm1, %v884_v45 }
  0x37   : > { %1053 = vmatpush1.msra.mxu0 %v2979_v46  ;;  %986 = vmatprep.mubr.f32.mxu1 %v3429_v16 }
  0x38   : > { %2961 = vmatmul.mubr.msk.f32.gmra.mxu0 %vm569_vm1, %v769_v47  ;;  %1054 = vmatprep.subr.mxu0 %v2978_v48  ;;  %v3846_v47 = vshrl.u32 %v1117_v39, 7  ;;  %v1420_v39 = vld [vmem:[%s4917_s6] sm:$0xff] }
  0x39   : > { %1055 = vmatpush1.msra.mxu0 %v2977_v49  ;;  %1090 = vmatprep.mubr.f32.mxu0 %v3429_v16 }
  0x3a   : > { %1056 = vmatprep.subr.mxu0 %v2976_v50  ;;  %2974 = vmatmul.mubr.msk.f32.gmra.mxu1 %vm569_vm1, %v885_v51 }
  0x3b   : > { %1057 = vmatpush1.msra.mxu0 %v2975_v52  ;;  %1206 = vmatprep.mubr.f32.mxu1 %v3429_v16 }
  0x3c   : > { %2985 = vmatmul.mubr.msk.f32.vlgmr.msra.gmra.mxu0 %vm569_vm1, %v999_v53  ;;  %1345 = vmatprep.subr.mxu0 %v3429_v16 }
  0x3d   : > { %1096 = vmatprep.mubr.f32.mxu0 %v3429_v16  ;;  %1346 = vmatpush1.msra.mxu0 %v1323_v56 }
  0x3e   : > { %1347 = vmatprep.subr.mxu0 %v3429_v16 }
  0x3f   : > { %1348 = vmatpush1.msra.mxu0 %v1322_v57  ;;  %v1123_v57 = vsub.s32 1, %v3846_v47 }
  0x40   : > { %2986 = vmatmul.mubr.msk.f32.gmra.mxu0 %vm569_vm1, %v1000_v54  ;;  %1349 = vmatprep.subr.mxu0 %v3429_v16 }
  0x41   : > { %1102 = vmatprep.mubr.f32.mxu0 %v3429_v16  ;;  %1350 = vmatpush1.msra.mxu0 %v1321_v58 }
  0x42   : > { %1351 = vmatprep.subr.mxu0 %v3429_v16 }
  0x43   : > { %1352 = vmatpush1.msra.mxu0 %v1320_v59 }
  0x44   : > { %2987 = vmatmul.mubr.msk.f32.gmra.mxu0 %vm569_vm1, %v1001_v55  ;;  %1353 = vmatprep.subr.mxu0 %v3429_v16 }
  0x45   : > { %1354 = vmatpush1.msra.mxu0 %v1319_v60  ;;  %v1119_v60 = vsub.s32 0, %v3846_v47  ;;  %v2158_v47 = vld [vmem:[%s4921_s10] sm:$0xf] }
  0x46   : > { %1355 = vmatprep.subr.mxu0 %v3429_v16 }
  0x47   : > { %1356 = vmatpush1.msra.mxu0 %v1318_v61 }
  0x48   : > { %1357 = vmatprep.subr.mxu0 %v3429_v16 }
  0x49   : > { %1358 = vmatpush1.msra.mxu0 %v1317_v62 }
  0x4a   : > { %1359 = vmatprep.subr.mxu0 %v3429_v16 }
  0x4b   : > { %1360 = vmatpush1.msra.mxu0 %v1316_v63 }
  0x4c   : > { %1361 = vmatprep.subr.mxu0 %v3429_v16 }
  0x4d   : > { %1362 = vmatpush1.msra.mxu0 %v1315_v0  ;;  %v1115_v0 = vld [vmem:[%s4947_s2] sm:$0x3]  ;;  %s3367_s2 = scalar_lea.vmem %s2871_s24, 16 }
  0x4e   : > { %1363 = vmatprep.subr.mxu0 %v3429_v16  ;;  %p3368_p11 = scmp.ne.s32.totalorder %s2871_s24, %s3367_s2  ;;  %p3375_p1 = scmp.lt.s32.totalorder %s3373_s26, %s3367_s2 }
  0x4f   : > { %1364 = vmatpush1.msra.mxu0 %v1314_v1 }
  0x50   : > { %1365 = vmatprep.subr.mxu0 %v3429_v16  ;;  %p3369_p12 = pnand %p3368_p11, %p3560_p5  ;;  %p3376_p2 = por %p3375_p1, %p3374_p0 }
  0x51   : > { %1366 = vmatpush1.msra.mxu0 %v1313_v2 }
  0x52   : > { %1367 = vmatprep.subr.mxu0 %v3429_v16  ;;  %p3370_p13 = pneg %p3369_p12 }
  0x53   : > { %1368 = vmatpush1.msra.mxu0 %v1312_v3 }
  0x54   : > { %1369 = vmatprep.subr.mxu0 %v3429_v16  ;;  %p3377_p3 = pnand %p3376_p2, %p3370_p13 }
  0x55   : > { %1370 = vmatpush1.msra.mxu0 %v1311_v4 }
  0x56   : > { %1371 = vmatprep.subr.mxu0 %v3429_v16 }
  0x57   : > { %1372 = vmatpush1.msra.mxu0 %v1310_v5  ;;  %v1124_v5 = vrot.slane %v1115_v0, %v1123_v57 }
  0x58   : > { %1373 = vmatprep.subr.mxu0 %v3429_v16 }
  0x59   : > { %1374 = vmatpush1.msra.mxu0 %v1309_v6 }
  0x5a   : > { %1375 = vmatprep.subr.mxu0 %v3429_v16 }
  0x5b   : > { %1376 = vmatpush1.msra.mxu0 %v1308_v7 }
  0x5c   : > { %1381 = vmatprep.subr.mxu0 %v3429_v16 }
  0x5d   : > { %1382 = vmatpush2.msra.mxu0 %v1337_v8 }
  0x5e   : > { %1383 = vmatprep.subr.mxu0 %v3429_v16 }
  0x5f   : > { %1384 = vmatpush2.msra.mxu0 %v1336_v9  ;;  %v1120_v9 = vrot.slane %v1115_v0, %v1119_v60  ;;  %v1563_v0 = vld [vmem:[%s4918_s7 + $0xe8] sm:$0xff] }
  0x60   : > { %1385 = vmatprep.subr.mxu0 %v3429_v16 }
  0x61   : > { %1386 = vmatpush2.msra.mxu0 %v1335_v10 }
  0x62   : > { %1387 = vmatprep.subr.mxu0 %v3429_v16 }
  0x63   : > { %1388 = vmatpush2.msra.mxu0 %v1334_v11 }
  0x64   : > { %1389 = vmatprep.subr.mxu0 %v3429_v16 }
  0x65   : > { %1390 = vmatpush2.msra.mxu0 %v1333_v12 }
  0x66   : > { %1391 = vmatprep.subr.mxu0 %v3429_v16 }
  0x67   : > { %1392 = vmatpush2.msra.mxu0 %v1332_v13 }
  0x68   : > { %1393 = vmatprep.subr.mxu0 %v3429_v16 }
  0x69   : > { %1394 = vmatpush2.msra.mxu0 %v1331_v14 }
  0x6a   : > { %1395 = vmatprep.subr.mxu0 %v3429_v16 }
  0xe3   : > { %v652_v15 = vpop.f32.mrf.mxu0 }
  0xe4   : > { %v750_v17 = vpop.f32.mrf.mxu1 }
  0xe5   : > { %v654_v18 = vpop.f32.mrf.mxu0  ;;  %v751_v52 = vadd.f32 %v750_v17, %v652_v15 }
  0xe6   : > { %v752_v19 = vpop.f32.mrf.mxu1 }
  0xe7   : > { %v658_v20 = vpop.f32.mrf.mxu0  ;;  %v753_v49 = vadd.f32 %v752_v19, %v654_v18 }
  0xe8   : > { %v756_v21 = vpop.f32.mrf.mxu1 }
  0xe9   : > { %v660_v22 = vpop.f32.mrf.mxu0  ;;  %v757_v45 = vadd.f32 %v756_v21, %v658_v20  ;;  %v1133_v20 = vld [vmem:[%s4914_s3] sm:$0xff]  ;;  %v1134_v21 = vld [vmem:[%s4914_s3 + $0x8] sm:$0xf] }
  0xea   : > { %v758_v23 = vpop.f32.mrf.mxu1 }
  0xeb   : > { %v664_v24 = vpop.f32.mrf.mxu0  ;;  %v759_v43 = vadd.f32 %v758_v23, %v660_v22  ;;  %v1219_v22 = vld [vmem:[%s4915_s4] sm:$0xff]  ;;  %v1435_v23 = vld [vmem:[%s4917_s6 + $0x78] sm:$0xff] }
  0xec   : > { %v762_v25 = vpop.f32.mrf.mxu1 }
  0xed   : > { %v666_v26 = vpop.f32.mrf.mxu0  ;;  %v763_v40 = vadd.f32 %v762_v25, %v664_v24  ;;  %v1434_v24 = vld [vmem:[%s4917_s6 + $0x70] sm:$0xff]  ;;  %v1220_v25 = vld [vmem:[%s4915_s4 + $0x8] sm:$0xf] }
  0xee   : > { %v764_v28 = vpop.f32.mrf.mxu1 }
  0xef   : > { %v765_v44 = vadd.f32 %v764_v28, %v666_v26  ;;  %v1433_v26 = vld [vmem:[%s4917_s6 + $0x68] sm:$0xff]  ;;  %v1431_v28 = vld [vmem:[%s4917_s6 + $0x58] sm:$0xff] }
  0xf0   : > { %v860_v27 = vpop.f32.mrf.mxu0 }
  0xf1   : > { %v877_v58 = vadd.f32 %v860_v27, %v751_v52  ;;  %v1432_v27 = vld [vmem:[%s4917_s6 + $0x60] sm:$0xff] }
  0xf2   : > { %v862_v29 = vpop.f32.mrf.mxu0  ;;  %v976_v30 = vpop.f32.mrf.mxu1  ;;  %v1328_v52 = vld [vmem:[%s4916_s5 + $0xa0] sm:$0xff] }
  0xf3   : > { %v878_v56 = vadd.f32 %v862_v29, %v753_v49  ;;  %v993_v8 = vadd.f32 %v976_v30, %v877_v58  ;;  %v1430_v29 = vld [vmem:[%s4917_s6 + $0x50] sm:$0xff]  ;;  %v1429_v30 = vld [vmem:[%s4917_s6 + $0x48] sm:$0xff] }
  0xf4   : > { %v866_v31 = vpop.f32.mrf.mxu0  ;;  %v978_v32 = vpop.f32.mrf.mxu1  ;;  %v1442_v49 = vld [vmem:[%s4917_s6 + $0xb0] sm:$0xff] }
  0xf5   : > { %v879_v53 = vadd.f32 %v866_v31, %v757_v45  ;;  %v994_v4 = vadd.f32 %v978_v32, %v878_v56  ;;  %v1428_v31 = vld [vmem:[%s4917_s6 + $0x40] sm:$0xff]  ;;  %v1427_v32 = vld [vmem:[%s4917_s6 + $0x38] sm:$0xff]  ;;  %v1326_v56 = vld [vmem:[%s4916_s5 + $0x90] sm:$0xff] }
  0xf6   : > { %v868_v33 = vpop.f32.mrf.mxu0  ;;  %v982_v34 = vpop.f32.mrf.mxu1  ;;  %v1444_v45 = vld [vmem:[%s4917_s6 + $0xc0] sm:$0xff]  ;;  %v1438_v58 = vld [vmem:[%s4917_s6 + $0x90] sm:$0xff] }
  0xf7   : > { %v880_v50 = vadd.f32 %v868_v33, %v759_v43  ;;  %v995_v1 = vadd.f32 %v982_v34, %v879_v53  ;;  %v1426_v33 = vld [vmem:[%s4917_s6 + $0x30] sm:$0xff]  ;;  %v1425_v34 = vld [vmem:[%s4917_s6 + $0x28] sm:$0xff]  ;;  %v1440_v53 = vld [vmem:[%s4917_s6 + $0xa0] sm:$0xff] }
  0xf8   : > { %v872_v35 = vpop.f32.mrf.mxu0  ;;  %v984_v36 = vpop.f32.mrf.mxu1  ;;  %v1446_v43 = vld [vmem:[%s4917_s6 + $0xd0] sm:$0xff] }
  0xf9   : > { %v881_v46 = vadd.f32 %v872_v35, %v763_v40  ;;  %v996_v62 = vadd.f32 %v984_v36, %v880_v50  ;;  %v1424_v35 = vld [vmem:[%s4917_s6 + $0x20] sm:$0xff]  ;;  %v1423_v36 = vld [vmem:[%s4917_s6 + $0x18] sm:$0xff]  ;;  %v1449_v40 = vld [vmem:[%s4917_s6 + $0xe8] sm:$0xff] }
  0xfa   : > { %v874_v37 = vpop.f32.mrf.mxu0  ;;  %v988_v41 = vpop.f32.mrf.mxu1  ;;  %v1329_v50 = vld [vmem:[%s4916_s5 + $0xa8] sm:$0xff] }
  0xfb   : > { %v882_v51 = vadd.f32 %v874_v37, %v765_v44  ;;  %v997_v59 = vadd.f32 %v988_v41, %v881_v46  ;;  %v1422_v37 = vld [vmem:[%s4917_s6 + $0x10] sm:$0xff]  ;;  %v1448_v41 = vld [vmem:[%s4917_s6 + $0xe0] sm:$0xff]  ;;  %v1445_v44 = vld [vmem:[%s4917_s6 + $0xc8] sm:$0xff] }
  0xfc   : > { %v1092_v38 = vpop.f32.mrf.mxu0  ;;  %v990_v54 = vpop.f32.mrf.mxu1  ;;  %v1443_v46 = vld [vmem:[%s4917_s6 + $0xb8] sm:$0xff] }
  0xfd   : > { %v998_v63 = vadd.f32 %v990_v54, %v882_v51  ;;  %v1109_v13 = vadd.f32 %v1092_v38, %v993_v8  ;;  %v1421_v38 = vld [vmem:[%s4917_s6 + $0x8] sm:$0xff]  ;;  %v1327_v54 = vld [vmem:[%s4916_s5 + $0x98] sm:$0xff] }
  0xfe   : > { %v1094_v42 = vpop.f32.mrf.mxu0  ;;  %v1441_v51 = vld [vmem:[%s4917_s6 + $0xa8] sm:$0xff] }
  0xff   : > { %v1110_v11 = vadd.f32 %v1094_v42, %v994_v4  ;;  %v1127_v19 = vadd.f32 %v1120_v9, %v1109_v13  ;;  %v1447_v42 = vld [vmem:[%s4917_s6 + $0xd8] sm:$0xff] }
 0x100   : > { %v1098_v48 = vpop.f32.mrf.mxu0  ;;  %v1561_v13 = vld [vmem:[%s4918_s7 + $0xd8] sm:$0xff] }
 0x101   : > { %v1111_v10 = vadd.f32 %v1098_v48, %v995_v1  ;;  %v1128_v18 = vadd.f32 %v1124_v5, %v1110_v11  ;;  %v1330_v48 = vld [vmem:[%s4916_s5 + $0xb0] sm:$0xff]  ;;  %v3025_v1 = vld [vmem:[%s4918_s7 + $0x1d8] sm:$0xff]  ;;  %v1562_v11 = vld [vmem:[%s4918_s7 + $0xe0] sm:$0xff] }
 0x102   : > { %v1100_v55 = vpop.f32.mrf.mxu0  ;;  %1396 = vmatpush2.msra.mxu0 %v1330_v48  ;;  %v3010_v48 = vld [vmem:[%s4918_s7 + $0x160] sm:$0xff] }
 0x103   : > { %v1112_v6 = vadd.f32 %v1100_v55, %v996_v62  ;;  %v1129_v17 = vadd.f32 %v1120_v9, %v1111_v10  ;;  %1397 = vmatprep.subr.mxu0 %v3429_v16  ;;  %v1439_v55 = vld [vmem:[%s4917_s6 + $0x98] sm:$0xff]  ;;  %v1324_v62 = vld [vmem:[%s4916_s5 + $0x80] sm:$0xff] }
 0x104   : > { %v1104_v61 = vpop.f32.mrf.mxu0  ;;  %1398 = vmatpush2.msra.mxu0 %v1329_v50  ;;  %v3009_v50 = vld [vmem:[%s4918_s7 + $0x158] sm:$0xff] }
 0x105   : > { %v1113_v2 = vadd.f32 %v1104_v61, %v997_v59  ;;  %v1130_v15 = vadd.f32 %v1124_v5, %v1112_v6  ;;  %1399 = vmatprep.subr.mxu0 %v3429_v16  ;;  %v1325_v59 = vld [vmem:[%s4916_s5 + $0x88] sm:$0xff] }
 0x106   : > { %v1106_v3 = vpop.f32.mrf.mxu0  ;;  %1400 = vmatpush2.msra.mxu0 %v1328_v52  ;;  %v1437_v61 = vld [vmem:[%s4917_s6 + $0x88] sm:$0xff]  ;;  %v3008_v52 = vld [vmem:[%s4918_s7 + $0x150] sm:$0xff] }
 0x107   : > { %v1114_v7 = vadd.f32 %v1106_v3, %v998_v63  ;;  %v1131_v14 = vadd.f32 %v1120_v9, %v1113_v2  ;;  %1401 = vmatprep.subr.mxu0 %v3429_v16  ;;  %v1436_v63 = vld [vmem:[%s4917_s6 + $0x80] sm:$0xff] }
 0x108   : > { %1402 = vmatpush2.msra.mxu0 %v1327_v54  ;;  %v3007_v54 = vld [vmem:[%s4918_s7 + $0x148] sm:$0xff] }
 0x109   : > { %v1132_v12 = vadd.f32 %v1124_v5, %v1114_v7  ;;  %1403 = vmatprep.subr.mxu0 %v3429_v16 }
 0x10a   : > { %1404 = vmatpush2.msra.mxu0 %v1326_v56  ;;  %v3006_v56 = vld [vmem:[%s4918_s7 + $0x140] sm:$0xff] }
 0x10b   : > { %1168 = vmatprep.subr.mxu1 %v1132_v12  ;;  %1405 = vmatprep.subr.mxu0 %v3429_v16 }
 0x10c   : > { %1169 = vmatpush1.msra.mxu1 %v1131_v14  ;;  %1406 = vmatpush2.msra.mxu0 %v1325_v59  ;;  %v3005_v59 = vld [vmem:[%s4918_s7 + $0x138] sm:$0xff] }
 0x10d   : > { %1170 = vmatprep.subr.mxu1 %v1130_v15  ;;  %1407 = vmatprep.subr.mxu0 %v3429_v16 }
 0x10e   : > { %1171 = vmatpush1.msra.mxu1 %v1129_v17  ;;  %1408 = vmatpush2.msra.mxu0 %v1324_v62  ;;  %v3004_v62 = vld [vmem:[%s4918_s7 + $0x130] sm:$0xff] }
 0x10f   : > { %1172 = vmatprep.subr.mxu1 %v1128_v18  ;;  %1601 = vmatprep.subr.mxu0 %v3025_v1  ;;  %v1537_v1 = vld [vmem:[%s4918_s7 + $0x18] sm:$0xff] }
 0x110   : > { %1173 = vmatpush1.msra.mxu1 %v1127_v19 }
 0x111   : > { %2988 = vmatmul.mubr.msk.f32.vlgmr.msra.gmra.mxu1 %vm1135_vm2, %v1133_v20  ;;  %1253 = vmatprep.subr.mxu1 %v1132_v12  ;;  %v3024_v12 = vld [vmem:[%s4918_s7 + $0x1d0] sm:$0xff]  ;;  %v3022_v20 = vld [vmem:[%s4918_s7 + $0x1c0] sm:$0xff] }
 0x112   : > { %1254 = vmatpush1.msra.mxu1 %v1131_v14  ;;  %1212 = vmatprep.mubr.f32.mxu1 %v3429_v16  ;;  %v3023_v14 = vld [vmem:[%s4918_s7 + $0x1c8] sm:$0xff] }
 0x113   : > { %1255 = vmatprep.subr.mxu1 %v1130_v15 }
 0x114   : > { %1256 = vmatpush1.msra.mxu1 %v1129_v17 }
 0x115   : > { %2989 = vmatmul.mubr.msk.f32.gmra.mxu1 %vm1135_vm2, %v1134_v21  ;;  %1257 = vmatprep.subr.mxu1 %v1128_v18  ;;  %v1559_v21 = vld [vmem:[%s4918_s7 + $0xc8] sm:$0xff] }
 0x116   : > { %1258 = vmatpush1.msra.mxu1 %v1127_v19  ;;  %1291 = vmatprep.mubr.f32.mxu1 %v3429_v16  ;;  %v1560_v19 = vld [vmem:[%s4918_s7 + $0xd0] sm:$0xff] }
 0x117   : > { %1450 = vmatprep.subr.mxu1 %v3429_v16 }
 0x119   : > { %2990 = vmatmul.mubr.msk.f32.vlgmr.msra.gmra.mxu1 %vm1135_vm2, %v1219_v22  ;;  %v3021_v22 = vld [vmem:[%s4918_s7 + $0x1b8] sm:$0xff] }
 0x11a   : > { %1297 = vmatprep.mubr.f32.mxu1 %v3429_v16  ;;  %1451 = vmatpush1.msra.mxu1 %v1435_v23  ;;  %v1558_v23 = vld [vmem:[%s4918_s7 + $0xc0] sm:$0xff] }
 0x11b   : > { %1452 = vmatprep.subr.mxu1 %v3429_v16 }
 0x11c   : > { %1453 = vmatpush1.msra.mxu1 %v1434_v24  ;;  %v3020_v24 = vld [vmem:[%s4918_s7 + $0x1b0] sm:$0xff] }
 0x11d   : > { %2991 = vmatmul.mubr.msk.f32.gmra.mxu1 %vm1135_vm2, %v1220_v25  ;;  %1454 = vmatprep.subr.mxu1 %v3429_v16  ;;  %v1557_v25 = vld [vmem:[%s4918_s7 + $0xb8] sm:$0xff] }
 0x11e   : > { %1455 = vmatpush1.msra.mxu1 %v1433_v26  ;;  %v3019_v26 = vld [vmem:[%s4918_s7 + $0x1a8] sm:$0xff] }
 0x11f   : > { %1456 = vmatprep.subr.mxu1 %v3429_v16 }
 0x120   : > { %1457 = vmatpush1.msra.mxu1 %v1432_v27  ;;  %v1556_v27 = vld [vmem:[%s4918_s7 + $0xb0] sm:$0xff] }
 0x121   : > { %1458 = vmatprep.subr.mxu1 %v3429_v16 }
 0x122   : > { %1459 = vmatpush1.msra.mxu1 %v1431_v28  ;;  %v3018_v28 = vld [vmem:[%s4918_s7 + $0x1a0] sm:$0xff] }
 0x123   : > { %1460 = vmatprep.subr.mxu1 %v3429_v16 }
 0x124   : > { %1461 = vmatpush1.msra.mxu1 %v1430_v29  ;;  %v1555_v29 = vld [vmem:[%s4918_s7 + $0xa8] sm:$0xff] }
 0x125   : > { %1462 = vmatprep.subr.mxu1 %v3429_v16 }
 0x126   : > { %1463 = vmatpush1.msra.mxu1 %v1429_v30  ;;  %v3017_v30 = vld [vmem:[%s4918_s7 + $0x198] sm:$0xff] }
 0x127   : > { %1464 = vmatprep.subr.mxu1 %v3429_v16 }
 0x128   : > { %1465 = vmatpush1.msra.mxu1 %v1428_v31  ;;  %v1554_v31 = vld [vmem:[%s4918_s7 + $0xa0] sm:$0xff] }
 0x129   : > { %1466 = vmatprep.subr.mxu1 %v3429_v16 }
 0x12a   : > { %1467 = vmatpush1.msra.mxu1 %v1427_v32  ;;  %v3016_v32 = vld [vmem:[%s4918_s7 + $0x190] sm:$0xff] }
 0x12b   : > { %1468 = vmatprep.subr.mxu1 %v3429_v16 }
 0x12c   : > { %1469 = vmatpush1.msra.mxu1 %v1426_v33  ;;  %v1553_v33 = vld [vmem:[%s4918_s7 + $0x98] sm:$0xff] }
 0x12d   : > { %1470 = vmatprep.subr.mxu1 %v3429_v16 }
 0x12e   : > { %1471 = vmatpush1.msra.mxu1 %v1425_v34  ;;  %v3015_v34 = vld [vmem:[%s4918_s7 + $0x188] sm:$0xff] }
 0x12f   : > { %1472 = vmatprep.subr.mxu1 %v3429_v16 }
 0x130   : > { %1473 = vmatpush1.msra.mxu1 %v1424_v35  ;;  %v1552_v35 = vld [vmem:[%s4918_s7 + $0x90] sm:$0xff] }
 0x131   : > { %1474 = vmatprep.subr.mxu1 %v3429_v16 }
 0x132   : > { %1475 = vmatpush1.msra.mxu1 %v1423_v36  ;;  %v3014_v36 = vld [vmem:[%s4918_s7 + $0x180] sm:$0xff] }
 0x133   : > { %1476 = vmatprep.subr.mxu1 %v3429_v16 }
 0x134   : > { %1477 = vmatpush1.msra.mxu1 %v1422_v37  ;;  %v1551_v37 = vld [vmem:[%s4918_s7 + $0x88] sm:$0xff] }
 0x135   : > { %1478 = vmatprep.subr.mxu1 %v3429_v16 }
 0x136   : > { %1479 = vmatpush1.msra.mxu1 %v1421_v38  ;;  %v3013_v38 = vld [vmem:[%s4918_s7 + $0x178] sm:$0xff] }
 0x137   : > { %1480 = vmatprep.subr.mxu1 %v3429_v16 }
 0x138   : > { %1481 = vmatpush1.msra.mxu1 %v1420_v39  ;;  %v1550_v39 = vld [vmem:[%s4918_s7 + $0x80] sm:$0xff] }
 0x139   : > { %1486 = vmatprep.subr.mxu1 %v3429_v16 }
 0x13a   : > { %1487 = vmatpush2.msra.mxu1 %v1449_v40  ;;  %v3012_v40 = vld [vmem:[%s4918_s7 + $0x170] sm:$0xff] }
 0x13b   : > { %1488 = vmatprep.subr.mxu1 %v3429_v16 }
 0x13c   : > { %1489 = vmatpush2.msra.mxu1 %v1448_v41  ;;  %v1549_v41 = vld [vmem:[%s4918_s7 + $0x78] sm:$0xff] }
 0x13d   : > { %1490 = vmatprep.subr.mxu1 %v3429_v16 }
 0x13e   : > { %1491 = vmatpush2.msra.mxu1 %v1447_v42  ;;  %v1548_v42 = vld [vmem:[%s4918_s7 + $0x70] sm:$0xff] }
 0x13f   : > { %1492 = vmatprep.subr.mxu1 %v3429_v16 }
 0x140   : > { %1493 = vmatpush2.msra.mxu1 %v1446_v43  ;;  %v1547_v43 = vld [vmem:[%s4918_s7 + $0x68] sm:$0xff] }
 0x141   : > { %1494 = vmatprep.subr.mxu1 %v3429_v16 }
 0x142   : > { %1495 = vmatpush2.msra.mxu1 %v1445_v44  ;;  %v1546_v44 = vld [vmem:[%s4918_s7 + $0x60] sm:$0xff] }
 0x143   : > { %1496 = vmatprep.subr.mxu1 %v3429_v16 }
 0x144   : > { %1497 = vmatpush2.msra.mxu1 %v1444_v45  ;;  %v3011_v45 = vld [vmem:[%s4918_s7 + $0x168] sm:$0xff] }
 0x145   : > { %1498 = vmatprep.subr.mxu1 %v3429_v16 }
 0x146   : > { %1499 = vmatpush2.msra.mxu1 %v1443_v46  ;;  %v1545_v46 = vld [vmem:[%s4918_s7 + $0x58] sm:$0xff] }
 0x147   : > { %1500 = vmatprep.subr.mxu1 %v3429_v16 }
 0x148   : > { %1501 = vmatpush2.msra.mxu1 %v1442_v49  ;;  %v1544_v49 = vld [vmem:[%s4918_s7 + $0x50] sm:$0xff] }
 0x149   : > { %1502 = vmatprep.subr.mxu1 %v3429_v16 }
 0x14a   : > { %1503 = vmatpush2.msra.mxu1 %v1441_v51  ;;  %v1543_v51 = vld [vmem:[%s4918_s7 + $0x48] sm:$0xff] }
 0x14b   : > { %1504 = vmatprep.subr.mxu1 %v3429_v16 }
 0x14c   : > { %1505 = vmatpush2.msra.mxu1 %v1440_v53  ;;  %v1542_v53 = vld [vmem:[%s4918_s7 + $0x40] sm:$0xff] }
 0x14d   : > { %1506 = vmatprep.subr.mxu1 %v3429_v16 }
 0x14e   : > { %1507 = vmatpush2.msra.mxu1 %v1439_v55  ;;  %v1541_v55 = vld [vmem:[%s4918_s7 + $0x38] sm:$0xff] }
 0x14f   : > { %1508 = vmatprep.subr.mxu1 %v3429_v16 }
 0x150   : > { %1509 = vmatpush2.msra.mxu1 %v1438_v58  ;;  %v1540_v58 = vld [vmem:[%s4918_s7 + $0x30] sm:$0xff] }
 0x151   : > { %1510 = vmatprep.subr.mxu1 %v3429_v16 }
 0x152   : > { %1511 = vmatpush2.msra.mxu1 %v1437_v61  ;;  %v1539_v61 = vld [vmem:[%s4918_s7 + $0x28] sm:$0xff] }
 0x153   : > { %1512 = vmatprep.subr.mxu1 %v3429_v16 }
 0x154   : > { %1513 = vmatpush2.msra.mxu1 %v1436_v63  ;;  %v1538_v63 = vld [vmem:[%s4918_s7 + $0x20] sm:$0xff] }
 0x155   : > { %1675 = vmatprep.subr.mxu1 %v1563_v0  ;;  %v3003_v0 = vld [vmem:[%s4918_s7 + $0x128] sm:$0xff] }
 0x1d1   : > { %v1208_v2 = vpop.f32.mrf.mxu1 }
 0x1d3   : > { %v1210_v3 = vpop.f32.mrf.mxu1 }
 0x1d5   : > { %v1214_v4 = vpop.f32.mrf.mxu1 }
 0x1d7   : > { %v1216_v5 = vpop.f32.mrf.mxu1 }
 0x1d9   : > { %v1293_v6 = vpop.f32.mrf.mxu1 }
 0x1da   : > { %v1304_v9 = vmax.f32 %v1208_v2, %v1293_v6  ;;  %v3002_v2 = vld [vmem:[%s4918_s7 + $0x120] sm:$0xff]  ;;  %v3000_v6 = vld [vmem:[%s4918_s7 + $0x110] sm:$0xff] }
 0x1db   : > { %v1295_v7 = vpop.f32.mrf.mxu1 }
 0x1dc   : > { %v1305_v8 = vmax.f32 %v1210_v3, %v1295_v7  ;;  %v1536_v3 = vld [vmem:[%s4918_s7 + $0x10] sm:$0xff]  ;;  %v1534_v7 = vld [vmem:[%s4918_s7] sm:$0xff] }
 0x1dd   : > { %v1299_v10 = vpop.f32.mrf.mxu1 }
 0x1de   : > { %2992 = vmatprep.mubr.msk.f32.mxu0 %vm1338_vm3, %v1305_v8  ;;  %2994 = vmatprep.mubr.msk.f32.mxu1 %vm1338_vm3, %v1305_v8  ;;  %v1306_v18 = vmax.f32 %v1214_v4, %v1299_v10  ;;  %v3001_v4 = vld [vmem:[%s4918_s7 + $0x118] sm:$0xff]  ;;  %v2999_v8 = vld [vmem:[%s4918_s7 + $0x108] sm:$0xff]  ;;  %v2998_v10 = vld [vmem:[%s4918_s7 + $0x100] sm:$0xff] }
 0x1df   : > { %v1301_v15 = vpop.f32.mrf.mxu1  ;;  %1410 = vmatmul.mubr.f32.vlgmr.msra.gmra.mxu0 %v1304_v9  ;;  %1515 = vmatmul.mubr.f32.vlgmr.msra.gmra.mxu1 %v1304_v9  ;;  %v3088_v9 = vld [vmem:[%s4918_s7 + $0x3b8] sm:$0xff] }
 0x1e0   : > { %v1307_v17 = vmax.f32 %v1216_v5, %v1301_v15  ;;  %1676 = vmatpush1.msra.mxu1 %v1562_v11  ;;  %1602 = vmatpush1.msra.mxu0 %v3024_v12  ;;  %v1535_v5 = vld [vmem:[%s4918_s7 + $0x8] sm:$0xff]  ;;  %v2997_v11 = vld [vmem:[%s4918_s7 + $0xf8] sm:$0xff]  ;;  %v2996_v12 = vld [vmem:[%s4918_s7 + $0xf0] sm:$0xff] }
 0x1e1   : > { %1677 = vmatprep.subr.mxu1 %v1561_v13  ;;  %1603 = vmatprep.subr.mxu0 %v3023_v14  ;;  %v3057_v13 = vld [vmem:[%s4918_s7 + $0x2c8] sm:$0xff] }
 0x1e2   : > { %2993 = vmatprep.mubr.msk.f32.mxu0 %vm1338_vm3, %v1307_v17  ;;  %2995 = vmatprep.mubr.msk.f32.mxu1 %vm1338_vm3, %v1307_v17 }
 0x1e3   : > { %1415 = vmatmul.mubr.f32.gmra.mxu0 %v1306_v18  ;;  %1520 = vmatmul.mubr.f32.gmra.mxu1 %v1306_v18 }
 0x1e4   : > { %1678 = vmatpush1.msra.mxu1 %v1560_v19  ;;  %1604 = vmatpush1.msra.mxu0 %v3022_v20 }
 0x1e5   : > { %1679 = vmatprep.subr.mxu1 %v1559_v21  ;;  %1605 = vmatprep.subr.mxu0 %v3021_v22 }
 0x1e6   : > { %1680 = vmatpush1.msra.mxu1 %v1558_v23  ;;  %1606 = vmatpush1.msra.mxu0 %v3020_v24 }
 0x1e7   : > { %1681 = vmatprep.subr.mxu1 %v1557_v25  ;;  %1607 = vmatprep.subr.mxu0 %v3019_v26 }
 0x1e8   : > { %1682 = vmatpush1.msra.mxu1 %v1556_v27  ;;  %1608 = vmatpush1.msra.mxu0 %v3018_v28  ;;  %v3087_v27 = vld [vmem:[%s4918_s7 + $0x3b0] sm:$0xff] }
 0x1e9   : > { %1683 = vmatprep.subr.mxu1 %v1555_v29  ;;  %1609 = vmatprep.subr.mxu0 %v3017_v30  ;;  %v3086_v29 = vld [vmem:[%s4918_s7 + $0x3a8] sm:$0xff]  ;;  %v3085_v30 = vld [vmem:[%s4918_s7 + $0x3a0] sm:$0xff] }
 0x1ea   : > { %1684 = vmatpush1.msra.mxu1 %v1554_v31  ;;  %1610 = vmatpush1.msra.mxu0 %v3016_v32  ;;  %v3084_v31 = vld [vmem:[%s4918_s7 + $0x398] sm:$0xff]  ;;  %v3056_v32 = vld [vmem:[%s4918_s7 + $0x2c0] sm:$0xff] }
 0x1eb   : > { %1685 = vmatprep.subr.mxu1 %v1553_v33  ;;  %1611 = vmatprep.subr.mxu0 %v3015_v34  ;;  %v3083_v33 = vld [vmem:[%s4918_s7 + $0x390] sm:$0xff] }
 0x1ec   : > { %1686 = vmatpush1.msra.mxu1 %v1552_v35  ;;  %1612 = vmatpush1.msra.mxu0 %v3014_v36  ;;  %v3055_v35 = vld [vmem:[%s4918_s7 + $0x2b8] sm:$0xff]  ;;  %v3082_v36 = vld [vmem:[%s4918_s7 + $0x388] sm:$0xff] }
 0x1ed   : > { %1687 = vmatprep.subr.mxu1 %v1551_v37  ;;  %1613 = vmatprep.subr.mxu0 %v3013_v38  ;;  %v3054_v37 = vld [vmem:[%s4918_s7 + $0x2b0] sm:$0xff]  ;;  %v3081_v38 = vld [vmem:[%s4918_s7 + $0x380] sm:$0xff] }
 0x1ee   : > { %1688 = vmatpush1.msra.mxu1 %v1550_v39  ;;  %1614 = vmatpush1.msra.mxu0 %v3012_v40  ;;  %v3053_v39 = vld [vmem:[%s4918_s7 + $0x2a8] sm:$0xff]  ;;  %v3080_v40 = vld [vmem:[%s4918_s7 + $0x378] sm:$0xff] }
 0x1ef   : > { %1689 = vmatprep.subr.mxu1 %v1549_v41  ;;  %1737 = vmatprep.mubr.f32.mxu1 %v3429_v16  ;;  %v3052_v41 = vld [vmem:[%s4918_s7 + $0x2a0] sm:$0xff] }
 0x1f0   : > { %1690 = vmatpush1.msra.mxu1 %v1548_v42  ;;  %1663 = vmatprep.mubr.f32.mxu0 %v3429_v16  ;;  %v3079_v42 = vld [vmem:[%s4918_s7 + $0x370] sm:$0xff] }
 0x1f1   : > { %1691 = vmatprep.subr.mxu1 %v1547_v43  ;;  %1615 = vmatprep.subr.mxu0 %v3011_v45  ;;  %v3051_v43 = vld [vmem:[%s4918_s7 + $0x298] sm:$0xff]  ;;  %v3050_v45 = vld [vmem:[%s4918_s7 + $0x290] sm:$0xff] }
 0x1f2   : > { %1692 = vmatpush1.msra.mxu1 %v1546_v44  ;;  %1616 = vmatpush1.msra.mxu0 %v3010_v48  ;;  %v3078_v44 = vld [vmem:[%s4918_s7 + $0x368] sm:$0xff] }
 0x1f3   : > { %1693 = vmatprep.subr.mxu1 %v1545_v46  ;;  %1617 = vmatprep.subr.mxu0 %v3009_v50  ;;  %v3077_v46 = vld [vmem:[%s4918_s7 + $0x360] sm:$0xff]  ;;  %v3049_v48 = vld [vmem:[%s4918_s7 + $0x288] sm:$0xff] }
 0x1f4   : > { %1694 = vmatpush1.msra.mxu1 %v1544_v49  ;;  %1618 = vmatpush1.msra.mxu0 %v3008_v52  ;;  %v3076_v49 = vld [vmem:[%s4918_s7 + $0x358] sm:$0xff]  ;;  %v3048_v50 = vld [vmem:[%s4918_s7 + $0x280] sm:$0xff] }
 0x1f5   : > { %1695 = vmatprep.subr.mxu1 %v1543_v51  ;;  %1619 = vmatprep.subr.mxu0 %v3007_v54  ;;  %v3075_v51 = vld [vmem:[%s4918_s7 + $0x350] sm:$0xff]  ;;  %v3047_v52 = vld [vmem:[%s4918_s7 + $0x278] sm:$0xff] }
 0x1f6   : > { %1696 = vmatpush1.msra.mxu1 %v1542_v53  ;;  %1620 = vmatpush1.msra.mxu0 %v3006_v56  ;;  %v3074_v53 = vld [vmem:[%s4918_s7 + $0x348] sm:$0xff]  ;;  %v3046_v54 = vld [vmem:[%s4918_s7 + $0x270] sm:$0xff] }
 0x1f7   : > { %1697 = vmatprep.subr.mxu1 %v1541_v55  ;;  %1621 = vmatprep.subr.mxu0 %v3005_v59  ;;  %v3073_v55 = vld [vmem:[%s4918_s7 + $0x340] sm:$0xff]  ;;  %v3045_v56 = vld [vmem:[%s4918_s7 + $0x268] sm:$0xff] }
 0x1f8   : > { %1698 = vmatpush1.msra.mxu1 %v1540_v58  ;;  %1622 = vmatpush1.msra.mxu0 %v3004_v62  ;;  %v3072_v58 = vld [vmem:[%s4918_s7 + $0x338] sm:$0xff]  ;;  %v3044_v59 = vld [vmem:[%s4918_s7 + $0x260] sm:$0xff] }
 0x1f9   : > { %1699 = vmatprep.subr.mxu1 %v1539_v61  ;;  %1623 = vmatprep.subr.mxu0 %v3003_v0  ;;  %v3071_v61 = vld [vmem:[%s4918_s7 + $0x330] sm:$0xff]  ;;  %v3043_v62 = vld [vmem:[%s4918_s7 + $0x258] sm:$0xff] }
 0x1fa   : > { %1700 = vmatpush1.msra.mxu1 %v1538_v63  ;;  %1624 = vmatpush1.msra.mxu0 %v3002_v2  ;;  %v3070_v63 = vld [vmem:[%s4918_s7 + $0x328] sm:$0xff]  ;;  %v3042_v0 = vld [vmem:[%s4918_s7 + $0x250] sm:$0xff] }
 0x1fb   : > { %1701 = vmatprep.subr.mxu1 %v1537_v1  ;;  %1625 = vmatprep.subr.mxu0 %v3001_v4  ;;  %v3069_v1 = vld [vmem:[%s4918_s7 + $0x320] sm:$0xff]  ;;  %v3041_v2 = vld [vmem:[%s4918_s7 + $0x248] sm:$0xff] }
 0x1fc   : > { %1702 = vmatpush1.msra.mxu1 %v1536_v3  ;;  %1626 = vmatpush1.msra.mxu0 %v3000_v6  ;;  %v3068_v3 = vld [vmem:[%s4918_s7 + $0x318] sm:$0xff]  ;;  %v3040_v4 = vld [vmem:[%s4918_s7 + $0x240] sm:$0xff] }
 0x1fd   : > { %1703 = vmatprep.subr.mxu1 %v1535_v5  ;;  %1627 = vmatprep.subr.mxu0 %v2999_v8  ;;  %v3067_v5 = vld [vmem:[%s4918_s7 + $0x310] sm:$0xff]  ;;  %v3039_v6 = vld [vmem:[%s4918_s7 + $0x238] sm:$0xff] }
 0x1fe   : > { %1704 = vmatpush1.msra.mxu1 %v1534_v7  ;;  %1628 = vmatpush1.msra.mxu0 %v2998_v10  ;;  %v3066_v7 = vld [vmem:[%s4918_s7 + $0x308] sm:$0xff]  ;;  %v3038_v8 = vld [vmem:[%s4918_s7 + $0x230] sm:$0xff] }
 0x1ff   : > { %1889 = vmatprep.subr.mxu1 %v3088_v9  ;;  %1629 = vmatprep.subr.mxu0 %v2997_v11  ;;  %v3065_v9 = vld [vmem:[%s4918_s7 + $0x300] sm:$0xff]  ;;  %v3037_v10 = vld [vmem:[%s4918_s7 + $0x228] sm:$0xff]  ;;  %v3064_v11 = vld [vmem:[%s4918_s7 + $0x2f8] sm:$0xff] }
 0x200   : > { %1630 = vmatpush1.msra.mxu0 %v2996_v12  ;;  %v3036_v12 = vld [vmem:[%s4918_s7 + $0x220] sm:$0xff] }
 0x201   : > { %1781 = vmatprep.subr.mxu0 %v3057_v13  ;;  %v3063_v13 = vld [vmem:[%s4918_s7 + $0x2f0] sm:$0xff] }
 0x29f   : > { %v1411_v14 = vpop.f32.mrf.mxu0  ;;  %v1516_v15 = vpop.f32.mrf.mxu1 }
 0x2a0   : > { %v1525_v17 = vmax.f32 %v1411_v14, %v1516_v15  ;;  %v3035_v14 = vld [vmem:[%s4918_s7 + $0x218] sm:$0xff]  ;;  %v3062_v15 = vld [vmem:[%s4918_s7 + $0x2e8] sm:$0xff] }
 0x2a1   : > { %v1413_v18 = vpop.f32.mrf.mxu0  ;;  %v1518_v19 = vpop.f32.mrf.mxu1 }
 0x2a2   : > { %v1527_v20 = vmax.f32 %v1525_v17, 0.0  ;;  %v3034_v17 = vld [vmem:[%s4918_s7 + $0x210] sm:$0xff]  ;;  %v3061_v18 = vld [vmem:[%s4918_s7 + $0x2e0] sm:$0xff]  ;;  %v3033_v19 = vld [vmem:[%s4918_s7 + $0x208] sm:$0xff] }
 0x2a3   : > { %v1416_v21 = vpop.f32.mrf.mxu0  ;;  %v1521_v22 = vpop.f32.mrf.mxu1 }
 0x2a4   : > { %1530 = vst.msk [vmem:[#allocation2] sm:$0xff] %vm1529_vm4, %v1527_v20  ;;  %v1526_v23 = vmax.f32 %v1416_v21, %v1521_v22  ;;  %v3060_v20 = vld [vmem:[%s4918_s7 + $0x2d8] sm:$0xff]  ;;  %v3032_v21 = vld [vmem:[%s4918_s7 + $0x200] sm:$0xff]  ;;  %v3059_v22 = vld [vmem:[%s4918_s7 + $0x2d0] sm:$0xff] }
 0x2a5   : > { %v1418_v24 = vpop.f32.mrf.mxu0  ;;  %v1523_v25 = vpop.f32.mrf.mxu1 }
 0x2a6   : > { %v1528_v26 = vmax.f32 %v1526_v23, 0.0  ;;  %v3031_v23 = vld [vmem:[%s4918_s7 + $0x1f8] sm:$0xff]  ;;  %v3030_v24 = vld [vmem:[%s4918_s7 + $0x1f0] sm:$0xff] }
 0x2a8   : > { %1532 = vst.msk [vmem:[#allocation2 + $0x8] sm:$0xf] %vm1531_vm5, %v1528_v26  ;;  %v3029_v26 = vld [vmem:[%s4918_s7 + $0x1e8] sm:$0xff] }
 0x2ab   : > { %v1533_v28 = vld [vmem:[#allocation2] sm:$0xff] }
 0x2ac   : > { %3027 = vmatmul.mubr.msk.f32.vlgmr.msra.gmra.mxu1 %vm1529_vm4, %v1533_v28  ;;  %v3119_v28 = vld [vmem:[%s4918_s7 + $0x4a8] sm:$0xff] }
 0x2ad   : > { %1890 = vmatpush1.msra.mxu1 %v3087_v27  ;;  %1951 = vmatprep.mubr.f32.mxu1 %v3429_v16  ;;  %v3028_v27 = vld [vmem:[%s4918_s7 + $0x1e0] sm:$0xff] }
 0x2ae   : > { %1891 = vmatprep.subr.mxu1 %v3086_v29  ;;  %v3118_v29 = vld [vmem:[%s4918_s7 + $0x4a0] sm:$0xff] }
 0x2af   : > { %1892 = vmatpush1.msra.mxu1 %v3085_v30  ;;  %v1564_v34 = vld [vmem:[#allocation2 + $0x1] sm:$0xff] }
 0x2b0   : > { %1893 = vmatprep.subr.mxu1 %v3084_v31  ;;  %3026 = vmatmul.mubr.msk.f32.vlgmr.msra.gmra.mxu0 %vm1529_vm4, %v1564_v34  ;;  %v1852_v25 = vld [vmem:[#allocation2 + $0x3] sm:$0xff]  ;;  %v3117_v31 = vld [vmem:[%s4918_s7 + $0x498] sm:$0xff] }
 0x2b1   : > { %1782 = vmatpush1.msra.mxu0 %v3056_v32  ;;  %1894 = vmatpush1.msra.mxu1 %v3083_v33  ;;  %v1744_v30 = vld [vmem:[#allocation2 + $0x2] sm:$0xff]  ;;  %v3116_v32 = vld [vmem:[%s4918_s7 + $0x490] sm:$0xff] }
 0x2b2   : > { %1783 = vmatprep.subr.mxu0 %v3055_v35  ;;  %1895 = vmatprep.subr.mxu1 %v3082_v36  ;;  %v3115_v33 = vld [vmem:[%s4918_s7 + $0x488] sm:$0xff]  ;;  %v3114_v34 = vld [vmem:[%s4918_s7 + $0x480] sm:$0xff]  ;;  %v3113_v35 = vld [vmem:[%s4918_s7 + $0x478] sm:$0xff] }
 0x2b3   : > { %1784 = vmatpush1.msra.mxu0 %v3054_v37  ;;  %1896 = vmatpush1.msra.mxu1 %v3081_v38  ;;  %v3112_v36 = vld [vmem:[%s4918_s7 + $0x470] sm:$0xff]  ;;  %v3111_v37 = vld [vmem:[%s4918_s7 + $0x468] sm:$0xff]  ;;  %v3110_v38 = vld [vmem:[%s4918_s7 + $0x460] sm:$0xff] }
 0x2b4   : > { %1785 = vmatprep.subr.mxu0 %v3053_v39  ;;  %1897 = vmatprep.subr.mxu1 %v3080_v40  ;;  %v3109_v39 = vld [vmem:[%s4918_s7 + $0x458] sm:$0xff]  ;;  %v3108_v40 = vld [vmem:[%s4918_s7 + $0x450] sm:$0xff] }
 0x2b5   : > { %1786 = vmatpush1.msra.mxu0 %v3052_v41  ;;  %1898 = vmatpush1.msra.mxu1 %v3079_v42  ;;  %v3107_v41 = vld [vmem:[%s4918_s7 + $0x448] sm:$0xff]  ;;  %v3106_v42 = vld [vmem:[%s4918_s7 + $0x440] sm:$0xff] }
 0x2b6   : > { %1787 = vmatprep.subr.mxu0 %v3051_v43  ;;  %1899 = vmatprep.subr.mxu1 %v3078_v44  ;;  %v3105_v43 = vld [vmem:[%s4918_s7 + $0x438] sm:$0xff]  ;;  %v3104_v44 = vld [vmem:[%s4918_s7 + $0x430] sm:$0xff] }
 0x2b7   : > { %1788 = vmatpush1.msra.mxu0 %v3050_v45  ;;  %1900 = vmatpush1.msra.mxu1 %v3077_v46  ;;  %v3103_v45 = vld [vmem:[%s4918_s7 + $0x428] sm:$0xff]  ;;  %v3102_v46 = vld [vmem:[%s4918_s7 + $0x420] sm:$0xff] }
 0x2b8   : > { %1789 = vmatprep.subr.mxu0 %v3049_v48  ;;  %1901 = vmatprep.subr.mxu1 %v3076_v49  ;;  %v3101_v48 = vld [vmem:[%s4918_s7 + $0x418] sm:$0xff]  ;;  %v3100_v49 = vld [vmem:[%s4918_s7 + $0x410] sm:$0xff] }
 0x2b9   : > { %1790 = vmatpush1.msra.mxu0 %v3048_v50  ;;  %1902 = vmatpush1.msra.mxu1 %v3075_v51  ;;  %v3099_v50 = vld [vmem:[%s4918_s7 + $0x408] sm:$0xff]  ;;  %v3098_v51 = vld [vmem:[%s4918_s7 + $0x400] sm:$0xff] }
 0x2ba   : > { %1791 = vmatprep.subr.mxu0 %v3047_v52  ;;  %1903 = vmatprep.subr.mxu1 %v3074_v53  ;;  %v3097_v52 = vld [vmem:[%s4918_s7 + $0x3f8] sm:$0xff]  ;;  %v3096_v53 = vld [vmem:[%s4918_s7 + $0x3f0] sm:$0xff] }
 0x2bb   : > { %1792 = vmatpush1.msra.mxu0 %v3046_v54  ;;  %1904 = vmatpush1.msra.mxu1 %v3073_v55  ;;  %v3095_v54 = vld [vmem:[%s4918_s7 + $0x3e8] sm:$0xff]  ;;  %v3094_v55 = vld [vmem:[%s4918_s7 + $0x3e0] sm:$0xff] }
 0x2bc   : > { %1793 = vmatprep.subr.mxu0 %v3045_v56  ;;  %1905 = vmatprep.subr.mxu1 %v3072_v58  ;;  %v3093_v56 = vld [vmem:[%s4918_s7 + $0x3d8] sm:$0xff]  ;;  %v3092_v58 = vld [vmem:[%s4918_s7 + $0x3d0] sm:$0xff] }
 0x2bd   : > { %1794 = vmatpush1.msra.mxu0 %v3044_v59  ;;  %1906 = vmatpush1.msra.mxu1 %v3071_v61  ;;  %v3091_v59 = vld [vmem:[%s4918_s7 + $0x3c8] sm:$0xff]  ;;  %v3090_v61 = vld [vmem:[%s4918_s7 + $0x3c0] sm:$0xff] }
 0x2be   : > { %1795 = vmatprep.subr.mxu0 %v3043_v62  ;;  %1907 = vmatprep.subr.mxu1 %v3070_v63  ;;  %v1960_v62 = vld [vmem:[#allocation2 + $0x4] sm:$0xff]  ;;  %v2344_v63 = vld [vmem:[%s4923_s12 + $0x78] sm:$0xff] }
 0x2bf   : > { %1796 = vmatpush1.msra.mxu0 %v3042_v0  ;;  %1908 = vmatpush1.msra.mxu1 %v3069_v1  ;;  %v2343_v0 = vld [vmem:[%s4923_s12 + $0x70] sm:$0xff]  ;;  %v2342_v1 = vld [vmem:[%s4923_s12 + $0x68] sm:$0xff] }
 0x2c0   : > { %1797 = vmatprep.subr.mxu0 %v3041_v2  ;;  %1909 = vmatprep.subr.mxu1 %v3068_v3  ;;  %v2341_v2 = vld [vmem:[%s4923_s12 + $0x60] sm:$0xff]  ;;  %v2340_v3 = vld [vmem:[%s4923_s12 + $0x58] sm:$0xff] }
 0x2c1   : > { %1798 = vmatpush1.msra.mxu0 %v3040_v4  ;;  %1910 = vmatpush1.msra.mxu1 %v3067_v5  ;;  %v2339_v4 = vld [vmem:[%s4923_s12 + $0x50] sm:$0xff]  ;;  %v2338_v5 = vld [vmem:[%s4923_s12 + $0x48] sm:$0xff] }
 0x2c2   : > { %1799 = vmatprep.subr.mxu0 %v3039_v6  ;;  %1911 = vmatprep.subr.mxu1 %v3066_v7  ;;  %v2337_v6 = vld [vmem:[%s4923_s12 + $0x40] sm:$0xff]  ;;  %v2336_v7 = vld [vmem:[%s4923_s12 + $0x38] sm:$0xff] }
 0x2c3   : > { %1800 = vmatpush1.msra.mxu0 %v3038_v8  ;;  %1912 = vmatpush1.msra.mxu1 %v3065_v9  ;;  %v2335_v8 = vld [vmem:[%s4923_s12 + $0x30] sm:$0xff]  ;;  %v2334_v9 = vld [vmem:[%s4923_s12 + $0x28] sm:$0xff] }
 0x2c4   : > { %1801 = vmatprep.subr.mxu0 %v3037_v10  ;;  %1913 = vmatprep.subr.mxu1 %v3064_v11  ;;  %v2333_v10 = vld [vmem:[%s4923_s12 + $0x20] sm:$0xff]  ;;  %v2332_v11 = vld [vmem:[%s4923_s12 + $0x18] sm:$0xff] }
 0x2c5   : > { %1802 = vmatpush1.msra.mxu0 %v3036_v12  ;;  %1914 = vmatpush1.msra.mxu1 %v3063_v13  ;;  %v2331_v12 = vld [vmem:[%s4923_s12 + $0x10] sm:$0xff]  ;;  %v2330_v13 = vld [vmem:[%s4923_s12 + $0x8] sm:$0xff] }
 0x2c6   : > { %1803 = vmatprep.subr.mxu0 %v3035_v14  ;;  %1915 = vmatprep.subr.mxu1 %v3062_v15 }
 0x2c7   : > { %1804 = vmatpush1.msra.mxu0 %v3034_v17  ;;  %1916 = vmatpush1.msra.mxu1 %v3061_v18 }
 0x2c8   : > { %1805 = vmatprep.subr.mxu0 %v3033_v19  ;;  %1917 = vmatprep.subr.mxu1 %v3060_v20 }
 0x2c9   : > { %1806 = vmatpush1.msra.mxu0 %v3032_v21  ;;  %1918 = vmatpush1.msra.mxu1 %v3059_v22 }
 0x2ca   : > { %1807 = vmatprep.subr.mxu0 %v3031_v23  ;;  %3089 = vmatmul.mubr.msk.f32.vlgmr.msra.gmra.mxu1 %vm1529_vm4, %v1852_v25 }
 0x2cb   : > { %1808 = vmatpush1.msra.mxu0 %v3030_v24  ;;  %1843 = vmatprep.mubr.f32.mxu0 %v3429_v16 }
 0x2cc   : > { %1809 = vmatprep.subr.mxu0 %v3029_v26  ;;  %2151 = vmatprep.mubr.f32.mxu1 %v3429_v16  ;;  %v2068_v26 = vld [vmem:[%s4919_s8] sm:$0x3] }
 0x2cd   : > { %1810 = vmatpush1.msra.mxu0 %v3028_v27 }
 0x2ce   : > { %3058 = vmatmul.mubr.msk.f32.vlgmr.msra.gmra.mxu0 %vm1529_vm4, %v1744_v30  ;;  %1997 = vmatprep.subr.mxu0 %v3119_v28 }
 0x2cf   : > { %1998 = vmatpush1.msra.mxu0 %v3118_v29  ;;  %2059 = vmatprep.mubr.f32.mxu0 %v3429_v16 }
 0x2d0   : > { %1999 = vmatprep.subr.mxu0 %v3117_v31  ;;  %v2077_v31 = vrot.slane %v2068_v26, %v1123_v57  ;;  %v2250_v57 = vld [vmem:[%s4922_s11 + $0x78] sm:$0xff] }
 0x2d1   : > { %2000 = vmatpush1.msra.mxu0 %v3116_v32 }
 0x2d2   : > { %2001 = vmatprep.subr.mxu0 %v3115_v33  ;;  %v2073_v33 = vrot.slane %v2068_v26, %v1119_v60  ;;  %v2249_v60 = vld [vmem:[%s4922_s11 + $0x70] sm:$0xff]  ;;  %v2425_v26 = vld [vmem:[%s4924_s13] sm:$0xff] }
 0x2d3   : > { %2002 = vmatpush1.msra.mxu0 %v3114_v34 }
 0x2d4   : > { %2003 = vmatprep.subr.mxu0 %v3113_v35 }
 0x2d5   : > { %2004 = vmatpush1.msra.mxu0 %v3112_v36 }
 0x2d6   : > { %2005 = vmatprep.subr.mxu0 %v3111_v37 }
 0x2d7   : > { %2006 = vmatpush1.msra.mxu0 %v3110_v38  ;;  %v2082_v38 = vld [vmem:[%s4920_s9] sm:$0xf] }
 0x2d8   : > { %2007 = vmatprep.subr.mxu0 %v3109_v39  ;;  %v2248_v39 = vld [vmem:[%s4922_s11 + $0x68] sm:$0xff] }
 0x2d9   : > { %2008 = vmatpush1.msra.mxu0 %v3108_v40  ;;  %v2247_v40 = vld [vmem:[%s4922_s11 + $0x60] sm:$0xff] }
 0x2da   : > { %2009 = vmatprep.subr.mxu0 %v3107_v41  ;;  %v2246_v41 = vld [vmem:[%s4922_s11 + $0x58] sm:$0xff] }
 0x2db   : > { %2010 = vmatpush1.msra.mxu0 %v3106_v42  ;;  %v2245_v42 = vld [vmem:[%s4922_s11 + $0x50] sm:$0xff] }
 0x2dc   : > { %2011 = vmatprep.subr.mxu0 %v3105_v43  ;;  %v2244_v43 = vld [vmem:[%s4922_s11 + $0x48] sm:$0xff] }
 0x2dd   : > { %2012 = vmatpush1.msra.mxu0 %v3104_v44  ;;  %v2243_v44 = vld [vmem:[%s4922_s11 + $0x40] sm:$0xff] }
 0x2de   : > { %2013 = vmatprep.subr.mxu0 %v3103_v45  ;;  %v2242_v45 = vld [vmem:[%s4922_s11 + $0x38] sm:$0xff] }
 0x2df   : > { %2014 = vmatpush1.msra.mxu0 %v3102_v46  ;;  %v2241_v46 = vld [vmem:[%s4922_s11 + $0x30] sm:$0xff] }
 0x2e0   : > { %2015 = vmatprep.subr.mxu0 %v3101_v48  ;;  %v2240_v48 = vld [vmem:[%s4922_s11 + $0x28] sm:$0xff] }
 0x2e1   : > { %2016 = vmatpush1.msra.mxu0 %v3100_v49  ;;  %v2239_v49 = vld [vmem:[%s4922_s11 + $0x20] sm:$0xff] }
 0x2e2   : > { %2017 = vmatprep.subr.mxu0 %v3099_v50  ;;  %v2238_v50 = vld [vmem:[%s4922_s11 + $0x18] sm:$0xff] }
 0x2e3   : > { %2018 = vmatpush1.msra.mxu0 %v3098_v51  ;;  %v2237_v51 = vld [vmem:[%s4922_s11 + $0x10] sm:$0xff] }
 0x2e4   : > { %2019 = vmatprep.subr.mxu0 %v3097_v52  ;;  %v2236_v52 = vld [vmem:[%s4922_s11 + $0x8] sm:$0xff] }
 0x2e5   : > { %2020 = vmatpush1.msra.mxu0 %v3096_v53  ;;  %v2235_v53 = vld [vmem:[%s4922_s11] sm:$0xff] }
 0x2e6   : > { %2021 = vmatprep.subr.mxu0 %v3095_v54  ;;  %v2329_v54 = vld [vmem:[%s4923_s12] sm:$0xff] }
 0x2e7   : > { %2022 = vmatpush1.msra.mxu0 %v3094_v55  ;;  %v2254_v55 = vld [vmem:[%s4922_s11 + $0x98] sm:$0xff] }
 0x2e8   : > { %2023 = vmatprep.subr.mxu0 %v3093_v56  ;;  %v2348_v56 = vld [vmem:[%s4923_s12 + $0x98] sm:$0xff] }
 0x2e9   : > { %2024 = vmatpush1.msra.mxu0 %v3092_v58  ;;  %v2253_v58 = vld [vmem:[%s4922_s11 + $0x90] sm:$0xff] }
 0x2ea   : > { %2025 = vmatprep.subr.mxu0 %v3091_v59  ;;  %v2347_v59 = vld [vmem:[%s4923_s12 + $0x90] sm:$0xff] }
 0x2eb   : > { %2026 = vmatpush1.msra.mxu0 %v3090_v61  ;;  %v2252_v61 = vld [vmem:[%s4922_s11 + $0x88] sm:$0xff] }
 0x2ec   : > { %3120 = vmatmul.mubr.msk.f32.vlgmr.msra.gmra.mxu0 %vm1529_vm4, %v1960_v62  ;;  %2349 = vmatprep.subr.mxu0 %v3429_v16  ;;  %v2346_v62 = vld [vmem:[%s4923_s12 + $0x88] sm:$0xff] }
 0x2ed   : > { %2350 = vmatpush1.msra.mxu0 %v2344_v63  ;;  %v2251_v63 = vld [vmem:[%s4922_s11 + $0x80] sm:$0xff] }
 0x2ee   : > { %2351 = vmatprep.subr.mxu0 %v3429_v16 }
 0x2ef   : > { %2352 = vmatpush1.msra.mxu0 %v2343_v0  ;;  %v2345_v0 = vld [vmem:[%s4923_s12 + $0x80] sm:$0xff] }
 0x2f0   : > { %2353 = vmatprep.subr.mxu0 %v3429_v16 }
 0x2f1   : > { %2354 = vmatpush1.msra.mxu0 %v2342_v1 }
 0x2f2   : > { %2355 = vmatprep.subr.mxu0 %v3429_v16 }
 0x2f3   : > { %2356 = vmatpush1.msra.mxu0 %v2341_v2 }
 0x2f4   : > { %2357 = vmatprep.subr.mxu0 %v3429_v16 }
 0x2f5   : > { %2358 = vmatpush1.msra.mxu0 %v2340_v3 }
 0x2f6   : > { %2359 = vmatprep.subr.mxu0 %v3429_v16 }
 0x2f7   : > { %2360 = vmatpush1.msra.mxu0 %v2339_v4 }
 0x2f8   : > { %2361 = vmatprep.subr.mxu0 %v3429_v16 }
 0x2f9   : > { %2362 = vmatpush1.msra.mxu0 %v2338_v5 }
 0x2fa   : > { %2363 = vmatprep.subr.mxu0 %v3429_v16 }
 0x2fb   : > { %2364 = vmatpush1.msra.mxu0 %v2337_v6 }
 0x2fc   : > { %2365 = vmatprep.subr.mxu0 %v3429_v16 }
 0x2fd   : > { %2366 = vmatpush1.msra.mxu0 %v2336_v7  ;;  %v2434_v7 = vld [vmem:[%s4924_s13 + $0x48] sm:$0xff] }
 0x2fe   : > { %2367 = vmatprep.subr.mxu0 %v3429_v16 }
 0x2ff   : > { %2368 = vmatpush1.msra.mxu0 %v2335_v8  ;;  %v3135_v8 = vld [vmem:[%s4924_s13 + $0x98] sm:$0xff] }
 0x300   : > { %2369 = vmatprep.subr.mxu0 %v3429_v16 }
 0x301   : > { %2370 = vmatpush1.msra.mxu0 %v2334_v9  ;;  %v2433_v9 = vld [vmem:[%s4924_s13 + $0x40] sm:$0xff] }
 0x302   : > { %2371 = vmatprep.subr.mxu0 %v3429_v16 }
 0x303   : > { %2372 = vmatpush1.msra.mxu0 %v2333_v10  ;;  %v3134_v10 = vld [vmem:[%s4924_s13 + $0x90] sm:$0xff] }
 0x304   : > { %2373 = vmatprep.subr.mxu0 %v3429_v16 }
 0x305   : > { %2374 = vmatpush1.msra.mxu0 %v2332_v11  ;;  %v2432_v11 = vld [vmem:[%s4924_s13 + $0x38] sm:$0xff] }
 0x306   : > { %2375 = vmatprep.subr.mxu0 %v3429_v16 }
 0x307   : > { %2376 = vmatpush1.msra.mxu0 %v2331_v12  ;;  %v3133_v12 = vld [vmem:[%s4924_s13 + $0x88] sm:$0xff] }
 0x308   : > { %2377 = vmatprep.subr.mxu0 %v3429_v16 }
 0x309   : > { %2378 = vmatpush1.msra.mxu0 %v2330_v13  ;;  %v2431_v13 = vld [vmem:[%s4924_s13 + $0x30] sm:$0xff] }
 0x30a   : > { %2379 = vmatprep.subr.mxu0 %v3429_v16 }
 0x30b   : > { %2380 = vmatpush1.msra.mxu0 %v2329_v54 }
 0x30c   : > { %2405 = vmatprep.subr.mxu0 %v3429_v16 }
 0x30d   : > { %2406 = vmatpush2.msra.mxu0 %v2348_v56  ;;  %v2775_v56 = vld [vmem:[%s4926_s15 + $0x30] sm:$0x3] }
 0x30e   : > { %2407 = vmatprep.subr.mxu0 %v3429_v16 }
 0x30f   : > { %2408 = vmatpush2.msra.mxu0 %v2347_v59  ;;  %v2773_v59 = vld [vmem:[%s4926_s15 + $0x20] sm:$0xff] }
 0x310   : > { %2409 = vmatprep.subr.mxu0 %v3429_v16 }
 0x311   : > { %2410 = vmatpush2.msra.mxu0 %v2346_v62  ;;  %v2771_v62 = vld [vmem:[%s4926_s15 + $0x10] sm:$0xff] }
 0x312   : > { %2411 = vmatprep.subr.mxu0 %v3429_v16 }
 0x313   : > { %2412 = vmatpush2.msra.mxu0 %v2345_v0  ;;  %v2769_v0 = vld [vmem:[%s4926_s15] sm:$0xff] }
 0x314   : > { %3240 = vmatprep.subr.mxu0 %v3429_v16 }
 0x36c   : > { %v1739_v17 = vpop.f32.mrf.mxu1 }
 0x36e   : > { %v1741_v19 = vpop.f32.mrf.mxu1 }
 0x370   : > { %v1665_v14 = vpop.f32.mrf.mxu0 }
 0x371   : > { %v1740_v20 = vadd.f32 %v1739_v17, %v1665_v14  ;;  %v3132_v14 = vld [vmem:[%s4924_s13 + $0x80] sm:$0xff]  ;;  %v3131_v17 = vld [vmem:[%s4924_s13 + $0x78] sm:$0xff] }
 0x372   : > { %v1667_v15 = vpop.f32.mrf.mxu0 }
 0x373   : > { %v1742_v22 = vadd.f32 %v1741_v19, %v1667_v15  ;;  %v2430_v15 = vld [vmem:[%s4924_s13 + $0x28] sm:$0xff]  ;;  %v3130_v19 = vld [vmem:[%s4924_s13 + $0x70] sm:$0xff] }
 0x38a   : > { %v1953_v23 = vpop.f32.mrf.mxu1 }
 0x38c   : > { %v1955_v27 = vpop.f32.mrf.mxu1 }
 0x38e   : > { %v1845_v18 = vpop.f32.mrf.mxu0 }
 0x38f   : > { %v1850_v24 = vadd.f32 %v1845_v18, %v1740_v20  ;;  %v2429_v18 = vld [vmem:[%s4924_s13 + $0x20] sm:$0xff]  ;;  %v2428_v20 = vld [vmem:[%s4924_s13 + $0x18] sm:$0xff] }
 0x390   : > { %v1847_v21 = vpop.f32.mrf.mxu0 }
 0x391   : > { %v1851_v25 = vadd.f32 %v1847_v21, %v1742_v22  ;;  %v1958_v28 = vadd.f32 %v1953_v23, %v1850_v24  ;;  %v3129_v21 = vld [vmem:[%s4924_s13 + $0x68] sm:$0xff]  ;;  %v2427_v22 = vld [vmem:[%s4924_s13 + $0x10] sm:$0xff]  ;;  %v3128_v23 = vld [vmem:[%s4924_s13 + $0x60] sm:$0xff] }
 0x392   : > { %v2426_v24 = vld [vmem:[%s4924_s13 + $0x8] sm:$0xff] }
 0x393   : > { %v1959_v30 = vadd.f32 %v1955_v27, %v1851_v25  ;;  %v3127_v25 = vld [vmem:[%s4924_s13 + $0x58] sm:$0xff]  ;;  %v3126_v27 = vld [vmem:[%s4924_s13 + $0x50] sm:$0xff] }
 0x3ac   : > { %v2061_v29 = vpop.f32.mrf.mxu0 }
 0x3ad   : > { %v2066_v32 = vadd.f32 %v2061_v29, %v1958_v28 }
 0x3ae   : > { %v2063_v34 = vpop.f32.mrf.mxu0 }
 0x3af   : > { %v2067_v35 = vadd.f32 %v2063_v34, %v1959_v30  ;;  %v2080_v37 = vadd.f32 %v2073_v33, %v2066_v32  ;;  %v3146_v34 = vld [vmem:[%s4924_s13 + $0xe8] sm:$0xff] }
 0x3b1   : > { %v2081_v36 = vadd.f32 %v2077_v31, %v2067_v35  ;;  %v3157_v35 = vld [vmem:[%s4924_s13 + $0x138] sm:$0xff] }
 0x3b3   : > { %2117 = vmatprep.subr.mxu1 %v2081_v36 }
 0x3b4   : > { %2118 = vmatpush1.msra.mxu1 %v2080_v37 }
 0x3b5   : > { %3121 = vmatmul.mubr.msk.f32.vlgmr.msra.gmra.mxu1 %vm2083_vm6, %v2082_v38  ;;  %2192 = vmatprep.subr.mxu1 %v2081_v36  ;;  %v3145_v38 = vld [vmem:[%s4924_s13 + $0xe0] sm:$0xff] }
 0x3b6   : > { %2193 = vmatpush1.msra.mxu1 %v2080_v37  ;;  %2226 = vmatprep.mubr.f32.mxu1 %v3429_v16 }
 0x3b7   : > { %2259 = vmatprep.subr.mxu1 %v3429_v16 }
 0x3b9   : > { %3122 = vmatmul.mubr.msk.f32.vlgmr.msra.gmra.mxu1 %vm2083_vm6, %v2158_v47  ;;  %v3156_v47 = vld [vmem:[%s4924_s13 + $0x130] sm:$0xff] }
 0x3ba   : > { %2260 = vmatpush1.msra.mxu1 %v2250_v57  ;;  %v3144_v57 = vld [vmem:[%s4924_s13 + $0xd8] sm:$0xff] }
 0x3bb   : > { %2261 = vmatprep.subr.mxu1 %v3429_v16 }
 0x3bc   : > { %2262 = vmatpush1.msra.mxu1 %v2249_v60  ;;  %v3155_v60 = vld [vmem:[%s4924_s13 + $0x128] sm:$0xff] }
 0x3bd   : > { %2263 = vmatprep.subr.mxu1 %v3429_v16 }
 0x3be   : > { %2264 = vmatpush1.msra.mxu1 %v2248_v39  ;;  %v3143_v39 = vld [vmem:[%s4924_s13 + $0xd0] sm:$0xff] }
 0x3bf   : > { %2265 = vmatprep.subr.mxu1 %v3429_v16 }
 0x3c0   : > { %2266 = vmatpush1.msra.mxu1 %v2247_v40  ;;  %v3154_v40 = vld [vmem:[%s4924_s13 + $0x120] sm:$0xff] }
 0x3c1   : > { %2267 = vmatprep.subr.mxu1 %v3429_v16 }
 0x3c2   : > { %2268 = vmatpush1.msra.mxu1 %v2246_v41  ;;  %v3142_v41 = vld [vmem:[%s4924_s13 + $0xc8] sm:$0xff] }
 0x3c3   : > { %2269 = vmatprep.subr.mxu1 %v3429_v16 }
 0x3c4   : > { %2270 = vmatpush1.msra.mxu1 %v2245_v42  ;;  %v3153_v42 = vld [vmem:[%s4924_s13 + $0x118] sm:$0xff] }
 0x3c5   : > { %2271 = vmatprep.subr.mxu1 %v3429_v16 }
 0x3c6   : > { %2272 = vmatpush1.msra.mxu1 %v2244_v43  ;;  %v3141_v43 = vld [vmem:[%s4924_s13 + $0xc0] sm:$0xff] }
 0x3c7   : > { %2273 = vmatprep.subr.mxu1 %v3429_v16 }
 0x3c8   : > { %2274 = vmatpush1.msra.mxu1 %v2243_v44  ;;  %v3152_v44 = vld [vmem:[%s4924_s13 + $0x110] sm:$0xff] }
 0x3c9   : > { %2275 = vmatprep.subr.mxu1 %v3429_v16 }
 0x3ca   : > { %2276 = vmatpush1.msra.mxu1 %v2242_v45  ;;  %v3140_v45 = vld [vmem:[%s4924_s13 + $0xb8] sm:$0xff] }
 0x3cb   : > { %2277 = vmatprep.subr.mxu1 %v3429_v16 }
 0x3cc   : > { %2278 = vmatpush1.msra.mxu1 %v2241_v46  ;;  %v3151_v46 = vld [vmem:[%s4924_s13 + $0x108] sm:$0xff] }
 0x3cd   : > { %2279 = vmatprep.subr.mxu1 %v3429_v16 }
 0x3ce   : > { %2280 = vmatpush1.msra.mxu1 %v2240_v48  ;;  %v3139_v48 = vld [vmem:[%s4924_s13 + $0xb0] sm:$0xff] }
 0x3cf   : > { %2281 = vmatprep.subr.mxu1 %v3429_v16 }
 0x3d0   : > { %2282 = vmatpush1.msra.mxu1 %v2239_v49  ;;  %v3150_v49 = vld [vmem:[%s4924_s13 + $0x100] sm:$0xff] }
 0x3d1   : > { %2283 = vmatprep.subr.mxu1 %v3429_v16 }
 0x3d2   : > { %2284 = vmatpush1.msra.mxu1 %v2238_v50  ;;  %v3138_v50 = vld [vmem:[%s4924_s13 + $0xa8] sm:$0xff] }
 0x3d3   : > { %2285 = vmatprep.subr.mxu1 %v3429_v16 }
 0x3d4   : > { %2286 = vmatpush1.msra.mxu1 %v2237_v51  ;;  %v3149_v51 = vld [vmem:[%s4924_s13 + $0xf8] sm:$0xff] }
 0x3d5   : > { %2287 = vmatprep.subr.mxu1 %v3429_v16 }
 0x3d6   : > { %2288 = vmatpush1.msra.mxu1 %v2236_v52  ;;  %v3137_v52 = vld [vmem:[%s4924_s13 + $0xa0] sm:$0xff] }
 0x3d7   : > { %2289 = vmatprep.subr.mxu1 %v3429_v16 }
 0x3d8   : > { %2290 = vmatpush1.msra.mxu1 %v2235_v53  ;;  %v3148_v53 = vld [vmem:[%s4924_s13 + $0xf0] sm:$0xff] }
 0x3d9   : > { %2315 = vmatprep.subr.mxu1 %v3429_v16 }
 0x3da   : > { %2316 = vmatpush2.msra.mxu1 %v2254_v55 }
 0x3db   : > { %2317 = vmatprep.subr.mxu1 %v3429_v16 }
 0x3dc   : > { %2318 = vmatpush2.msra.mxu1 %v2253_v58  ;;  %v2774_v58 = vld [vmem:[%s4926_s15 + $0x28] sm:$0xff] }
 0x3dd   : > { %2319 = vmatprep.subr.mxu1 %v3429_v16 }
 0x3de   : > { %2320 = vmatpush2.msra.mxu1 %v2252_v61  ;;  %v2772_v61 = vld [vmem:[%s4926_s15 + $0x18] sm:$0xff] }
 0x3df   : > { %2321 = vmatprep.subr.mxu1 %v3429_v16 }
 0x3e0   : > { %2322 = vmatpush2.msra.mxu1 %v2251_v63  ;;  %v2770_v63 = vld [vmem:[%s4926_s15 + $0x8] sm:$0xff] }
 0x3e1   : > { %3217 = vmatprep.subr.mxu1 %v3429_v16 }
 0x475   : > { %v2153_v1 = vpop.f32.mrf.mxu1 }
 0x477   : > { %v2155_v2 = vpop.f32.mrf.mxu1 }
 0x479   : > { %v2228_v3 = vpop.f32.mrf.mxu1 }
 0x47a   : > { %v2233_v6 = vmax.f32 %v2153_v1, %v2228_v3 }
 0x47b   : > { %v2230_v4 = vpop.f32.mrf.mxu1 }
 0x47c   : > { %v2234_v5 = vmax.f32 %v2155_v2, %v2230_v4 }
 0x47e   : > { %3123 = vmatprep.mubr.msk.f32.mxu1 %vm2255_vm7, %v2234_v5  ;;  %3124 = vmatprep.mubr.msk.f32.mxu0 %vm2255_vm7, %v2234_v5  ;;  %v2423_v5 = vld [vmem:[%s4925_s14] sm:$0x1] }
 0x47f   : > { %2324 = vmatmul.mubr.f32.vlgmr.msra.gmra.mxu1 %v2233_v6  ;;  %2414 = vmatmul.mubr.f32.vlgmr.msra.gmra.mxu0 %v2233_v6 }
 0x480   : > { %3218 = vmatpush3.msra.mxu1 %v2434_v7  ;;  %3241 = vmatpush3.msra.mxu0 %v3135_v8 }
 0x481   : > { %3219 = vmatprep.subr.mxu1 %v3429_v16  ;;  %3242 = vmatprep.subr.mxu0 %v3429_v16 }
 0x482   : > { %3220 = vmatpush3.msra.mxu1 %v2433_v9  ;;  %3243 = vmatpush3.msra.mxu0 %v3134_v10 }
 0x483   : > { %3221 = vmatprep.subr.mxu1 %v3429_v16  ;;  %3244 = vmatprep.subr.mxu0 %v3429_v16 }
 0x484   : > { %3222 = vmatpush3.msra.mxu1 %v2432_v11  ;;  %3245 = vmatpush3.msra.mxu0 %v3133_v12 }
 0x485   : > { %3223 = vmatprep.subr.mxu1 %v3429_v16  ;;  %3246 = vmatprep.subr.mxu0 %v3429_v16 }
 0x486   : > { %3224 = vmatpush3.msra.mxu1 %v2431_v13  ;;  %3247 = vmatpush3.msra.mxu0 %v3132_v14  ;;  %v2776_v14 = vld [vmem:[%s4927_s16] sm:$0x1] }
 0x487   : > { %3225 = vmatprep.subr.mxu1 %v3429_v16  ;;  %3248 = vmatprep.subr.mxu0 %v3429_v16 }
 0x488   : > { %3226 = vmatpush3.msra.mxu1 %v2430_v15  ;;  %3249 = vmatpush3.msra.mxu0 %v3131_v17 }
 0x489   : > { %3227 = vmatprep.subr.mxu1 %v3429_v16  ;;  %3250 = vmatprep.subr.mxu0 %v3429_v16 }
 0x48a   : > { %3228 = vmatpush3.msra.mxu1 %v2429_v18  ;;  %3251 = vmatpush3.msra.mxu0 %v3130_v19 }
 0x48b   : > { %3229 = vmatprep.subr.mxu1 %v3429_v16  ;;  %3252 = vmatprep.subr.mxu0 %v3429_v16 }
 0x48c   : > { %3230 = vmatpush3.msra.mxu1 %v2428_v20  ;;  %3253 = vmatpush3.msra.mxu0 %v3129_v21 }
 0x48d   : > { %3231 = vmatprep.subr.mxu1 %v3429_v16  ;;  %3254 = vmatprep.subr.mxu0 %v3429_v16 }
 0x48e   : > { %3232 = vmatpush3.msra.mxu1 %v2427_v22  ;;  %3255 = vmatpush3.msra.mxu0 %v3128_v23 }
 0x48f   : > { %3233 = vmatprep.subr.mxu1 %v3429_v16  ;;  %3256 = vmatprep.subr.mxu0 %v3429_v16 }
 0x490   : > { %3234 = vmatpush3.msra.mxu1 %v2426_v24  ;;  %3257 = vmatpush3.msra.mxu0 %v3127_v25 }
 0x491   : > { %3235 = vmatprep.subr.mxu1 %v3429_v16  ;;  %3258 = vmatprep.subr.mxu0 %v3429_v16 }
 0x492   : > { %3236 = vmatpush3.msra.mxu1 %v2425_v26  ;;  %3259 = vmatpush3.msra.mxu0 %v3126_v27 }
 0x493   : > { %3237 = vmatprep.mubr.msk.f32.mxu1 %vm3430_vm8, %v3429_v16  ;;  %3260 = vmatprep.mubr.msk.f32.mxu0 %vm3430_vm8, %v3429_v16 }
 0x494   : > { %3263 = vmatprep.subr.mxu1 %v3429_v16  ;;  %3286 = vmatprep.subr.mxu0 %v3429_v16 }
 0x53f   : > { %v2325_v28 = vpop.f32.mrf.mxu1  ;;  %v2415_v29 = vpop.f32.mrf.mxu0 }
 0x540   : > { %v2419_v30 = vmax.f32 %v2325_v28, %v2415_v29 }
 0x541   : > { %v2327_v31 = vpop.f32.mrf.mxu1  ;;  %v2417_v32 = vpop.f32.mrf.mxu0 }
 0x542   : > { %v2420_v33 = vmax.f32 %v2419_v30, 0.0 }
 0x544   : > { %2422 = vst.msk [vmem:[#allocation3] sm:$0xf] %vm2421_vm9, %v2420_v33 }
 0x54b   : > { %v2424_v36 = vld [vmem:[#allocation3] sm:$0x1]  ;;  %v2510_v37 = vld [vmem:[#allocation3 + $0x1] sm:$0x1]  ;;  %v2596_v54 = vld [vmem:[#allocation3 + $0x2] sm:$0x1] }
 0x54c   : > { %3238 = vmatmul.mubr.msk.f32.vlgmr.msra.gmra.mxu1 %vm2435_vm10, %v2424_v36  ;;  %3261 = vmatmul.mubr.msk.f32.vlgmr.msra.gmra.mxu0 %vm2435_vm10, %v2510_v37  ;;  %v2682_v55 = vld [vmem:[#allocation3 + $0x3] sm:$0x1] }
 0x54d   : > { %3264 = vmatpush3.msra.mxu1 %v3146_v34  ;;  %3287 = vmatpush3.msra.mxu0 %v3157_v35 }
 0x54e   : > { %3265 = vmatprep.subr.mxu1 %v3429_v16  ;;  %3288 = vmatprep.subr.mxu0 %v3429_v16 }
 0x54f   : > { %3266 = vmatpush3.msra.mxu1 %v3145_v38  ;;  %3289 = vmatpush3.msra.mxu0 %v3156_v47 }
 0x550   : > { %3267 = vmatprep.subr.mxu1 %v3429_v16  ;;  %3290 = vmatprep.subr.mxu0 %v3429_v16 }
 0x551   : > { %3268 = vmatpush3.msra.mxu1 %v3144_v57  ;;  %3291 = vmatpush3.msra.mxu0 %v3155_v60 }
 0x552   : > { %3269 = vmatprep.subr.mxu1 %v3429_v16  ;;  %3292 = vmatprep.subr.mxu0 %v3429_v16 }
 0x553   : > { %3270 = vmatpush3.msra.mxu1 %v3143_v39  ;;  %3293 = vmatpush3.msra.mxu0 %v3154_v40 }
 0x554   : > { %3271 = vmatprep.subr.mxu1 %v3429_v16  ;;  %3294 = vmatprep.subr.mxu0 %v3429_v16 }
 0x555   : > { %3272 = vmatpush3.msra.mxu1 %v3142_v41  ;;  %3295 = vmatpush3.msra.mxu0 %v3153_v42 }
 0x556   : > { %3273 = vmatprep.subr.mxu1 %v3429_v16  ;;  %3296 = vmatprep.subr.mxu0 %v3429_v16 }
 0x557   : > { %3274 = vmatpush3.msra.mxu1 %v3141_v43  ;;  %3297 = vmatpush3.msra.mxu0 %v3152_v44 }
 0x558   : > { %3275 = vmatprep.subr.mxu1 %v3429_v16  ;;  %3298 = vmatprep.subr.mxu0 %v3429_v16 }
 0x559   : > { %3276 = vmatpush3.msra.mxu1 %v3140_v45  ;;  %3299 = vmatpush3.msra.mxu0 %v3151_v46 }
 0x55a   : > { %3277 = vmatprep.subr.mxu1 %v3429_v16  ;;  %3300 = vmatprep.subr.mxu0 %v3429_v16 }
 0x55b   : > { %3278 = vmatpush3.msra.mxu1 %v3139_v48  ;;  %3301 = vmatpush3.msra.mxu0 %v3150_v49 }
 0x55c   : > { %3279 = vmatprep.subr.mxu1 %v3429_v16  ;;  %3302 = vmatprep.subr.mxu0 %v3429_v16 }
 0x55d   : > { %3280 = vmatpush3.msra.mxu1 %v3138_v50  ;;  %3303 = vmatpush3.msra.mxu0 %v3149_v51 }
 0x55e   : > { %3281 = vmatprep.subr.mxu1 %v3429_v16  ;;  %3304 = vmatprep.subr.mxu0 %v3429_v16 }
 0x55f   : > { %3282 = vmatpush3.msra.mxu1 %v3137_v52  ;;  %3283 = vmatprep.mubr.msk.f32.mxu1 %vm3430_vm8, %v3429_v16 }
 0x560   : > { %3305 = vmatpush3.msra.mxu0 %v3148_v53  ;;  %3306 = vmatprep.mubr.msk.f32.mxu0 %vm3430_vm8, %v3429_v16 }
 0x561   : > { %3284 = vmatmul.mubr.msk.f32.vlgmr.msra.gmra.mxu1 %vm2435_vm10, %v2596_v54  ;;  %3307 = vmatmul.mubr.msk.f32.vlgmr.msra.gmra.mxu0 %vm2435_vm10, %v2682_v55 }
 0x562   : > { %3309 = vmatprep.subr.mxu1 %v3429_v16  ;;  %3323 = vmatprep.mubr.msk.f32.mxu1 %vm3430_vm8, %v3429_v16 }
 0x563   : > { %3310 = vmatpush3.msk.msra.mxu1 %vm2781_vm11, %v2775_v56 }
 0x564   : > { %3311 = vmatprep.subr.mxu1 %v3429_v16 }
 0x565   : > { %3312 = vmatpush3.msra.mxu1 %v2774_v58 }
 0x566   : > { %3313 = vmatprep.subr.mxu1 %v3429_v16 }
 0x567   : > { %3314 = vmatpush3.msra.mxu1 %v2773_v59 }
 0x568   : > { %3315 = vmatprep.subr.mxu1 %v3429_v16 }
 0x569   : > { %3316 = vmatpush3.msra.mxu1 %v2772_v61 }
 0x56a   : > { %3317 = vmatprep.subr.mxu1 %v3429_v16 }
 0x56b   : > { %3318 = vmatpush3.msra.mxu1 %v2771_v62 }
 0x56c   : > { %3319 = vmatprep.subr.mxu1 %v3429_v16 }
 0x56d   : > { %3320 = vmatpush3.msra.mxu1 %v2770_v63 }
 0x56e   : > { %3321 = vmatprep.subr.mxu1 %v3429_v16 }
 0x56f   : > { %3322 = vmatpush3.msra.mxu1 %v2769_v0 }
 0x60c   : > { %v2505_v1 = vpop.f32.mrf.mxu1  ;;  %v2591_v2 = vpop.f32.mrf.mxu0 }
 0x60d   : > { %v2509_v6 = vadd.f32 %v2505_v1, %v2423_v5 }
 0x60e   : > { %v3239_v3 = vpop.f32.mrf.mxu1  ;;  %v3262_v4 = vpop.f32.mrf.mxu0 }
 0x60f   : > { %v2595_v7 = vadd.f32 %v2591_v2, %v2509_v6 }
 0x621   : > { %v2677_v8 = vpop.f32.mrf.mxu1  ;;  %v2763_v9 = vpop.f32.mrf.mxu0 }
 0x622   : > { %v2681_v16 = vadd.f32 %v2677_v8, %v2595_v7 }
 0x623   : > { %v3285_v10 = vpop.f32.mrf.mxu1  ;;  %v3308_v11 = vpop.f32.mrf.mxu0 }
 0x624   : > { %v2767_v12 = vadd.f32 %v2763_v9, %v2681_v16 }
 0x626   : > { %v2768_v13 = vmax.f32 %v2767_v12, 0.0 }
 0x628   : > { %3324 = vmatmul.mubr.msk.f32.vlgmr.msra.gmra.mxu1 %vm2777_vm12, %v2768_v13 }
 0x6e8   : > { %v2851_v15 = vpop.f32.mrf.mxu1 }
 0x6e9   : > { %v2852_v17 = vadd.f32 %v2851_v15, %v2776_v14 }
 0x6ea   : > { %v3325_v18 = vpop.f32.mrf.mxu1 }
 0x6eb   : > { %2856 = vst.msk [vmem:[%s540_s18] sm:$0x1] %vm2855_vm13, %v2852_v17 }
 0x6ec   : > { %3380 = shalt.err (!%p3377_p3)
}
 0x6ed   : > { %s3381_s0 = scalar_lea.hbm %s4876_s22, 16  ;;  %s3385_s20 = scalar_lea.hbm %s4928_s17, 32 }
 0x6ee   : > { %p3382_p4 = scmp.ne.s32.totalorder %s4876_s22, %s3381_s0  ;;  %p3386_p9 = scmp.lt.s32.totalorder %s4876_s22, %s4928_s17 }
 0x6ef   : > { %p3387_p10 = scmp.lt.s32.totalorder %s3385_s20, %s3381_s0 }
 0x6f0   : > { %p3383_p7 = pnand %p3382_p4, %p3560_p5 }
 0x6f1   : > { %p3388_p11 = por %p3387_p10, %p3386_p9 }
 0x6f2   : > { %p3384_p8 = pneg %p3383_p7 }
 0x6f4   : > { %p3389_p12 = pnand %p3388_p11, %p3384_p8 }
 0x6f6   : > { %3392 = shalt.err (!%p3389_p12)
}
 0x6f7   : > { %3326 = dma.vmem_to_hbm [thread:$0]  (%p3560_p5), %s2871_s24, 16, %s4876_s22, %s2858_s19  }
 0x6f8 PF: > { %s4948_s2 = sld [smem:[#allocation7_spill]]  ;;  %p3332_p13 = scmp.ge.s32.totalorder %s3427_s27, 2 }
 0x6fa   : > { %p3329_p0 = pnand %p3332_p13, %p3564_p6 }
 0x6fc   : > { %p3330_p1 = pneg %p3329_p0 }
 0x6fe   : > { %s2882_s26 = sand.u32 1, %s4948_s2  }
 0x6ff   : > { %s2883_s29 = scalar_lea.sflag [#allocation5], %s2882_s26 }
 0x700   : > { %3410 = dma.done.wait (%p3330_p1), %s2883_s29, 16  }
 0x701   : > { %3412 = vsyncadd (%p3330_p1), %s2883_s29, 4294967280  ;;  %s4950_s27 = sld [smem:[#allocation9_spill]]  ;;  %s4953_s24 = smov %s3419_s25 }
 0x702   : > { %s4951_s0 = sld [smem:[#allocation8_spill]] }
 0x703   : > { %s4952_s26 = sld [smem:[#allocation10_spill]] }
 0x707   : > { %p27_p2 = scmp.ge.s32.totalorder %s4950_s27, 4  }
 0x708   : > { %s4954_s25 = smov %s4951_s0 }
 0x709   :  { %29 = sbr.rel (!%p27_p2) target bundleno = 7 (0x7), region = 134 }
 0x70e   :  { %2887 = vsyncpa [#allocation5], 1 }
 0x70f   :  { %2889 = vsyncpa [#allocation5 + $0x1], 1 }

</bundles_post_ra>
